<compile_context>
chip_gen: v7x
topology: tpu7x:2x2x1
jax: 0.10.0
libtpu: 0.0.40
codegen_flags: <defaults>
</compile_context>

<pallas_src>
import jax
import jax.numpy as jnp
from jax import lax
from jax.experimental import pallas as pl
from jax.experimental.pallas import tpu as pltpu


def make_mha_kernel(n_heads: int, head_dim: int, compute_dtype, approx_recip: bool):
    def kernel(q_ref, k_ref, v_ref,
               wq_ref, bq_ref, wk_ref, bk_ref, wv_ref, bv_ref,
               wo_ref, bo_ref,
               out_ref, attn_ref,
               kproj_ref, vproj_ref, ctx_ref):
        qt = pl.program_id(1)

        # --- K/V projections: once per batch element, kept resident in VMEM
        # scratch (compute_dtype) across the sequential query-tile axis.
        @pl.when(qt == 0)
        def _project_kv():
            k = k_ref[0].astype(compute_dtype)          # [S, H]
            v = v_ref[0].astype(compute_dtype)
            kproj_ref[...] = (jnp.dot(k, wk_ref[...],
                                      preferred_element_type=jnp.float32)
                              + bk_ref[...]).astype(kproj_ref.dtype)
            vproj_ref[...] = (jnp.dot(v, wv_ref[...],
                                      preferred_element_type=jnp.float32)
                              + bv_ref[...]).astype(vproj_ref.dtype)

        # --- Q projection for this query tile (1/sqrt(dh) folded into wq/bq).
        q = q_ref[0].astype(compute_dtype)               # [tq, H]
        Q = (jnp.dot(q, wq_ref[...], preferred_element_type=jnp.float32)
             + bq_ref[...]).astype(compute_dtype)        # [tq, H]

        # --- Per-head attention (static small loop; n_heads is compile-time).
        for h in range(n_heads):
            lo = h * head_dim
            hi = lo + head_dim
            Qh = Q[:, lo:hi]                 # [tq, dh] compute_dtype
            Kh = kproj_ref[:, lo:hi]         # [S,  dh] compute_dtype
            Vh = vproj_ref[:, lo:hi]         # [S,  dh] compute_dtype

            # energy = (Q Wq / sqrt(dh)) K^T   -> [tq, S]
            # "nt" contraction (last axis of both); no explicit .T relayout.
            energy = lax.dot_general(Qh, Kh, (((1,), (1,)), ((), ())),
                                     preferred_element_type=jnp.float32)

            # Numerically stable softmax; reciprocal goes to the EUP slot.
            m = jnp.max(energy, axis=-1, keepdims=True)
            e = jnp.exp(energy - m)
            denom = jnp.sum(e, axis=-1, keepdims=True)
            attn = e * pl.reciprocal(denom, approx=approx_recip)

            attn_ref[0, h] = attn.astype(attn_ref.dtype)

            # Per-head context lands in its column block of the ctx scratch so
            # the output projection below is one full-width matmul.
            ctx_ref[:, lo:hi] = jnp.dot(attn.astype(compute_dtype), Vh,
                                        preferred_element_type=jnp.float32
                                        ).astype(ctx_ref.dtype)

        # --- Single output projection over all heads: [tq, H] x [H, H].
        out_ref[0] = (jnp.dot(ctx_ref[...], wo_ref[...],
                              preferred_element_type=jnp.float32)
                      + bo_ref[...]).astype(out_ref.dtype)

    return kernel


def multi_head_attention(query, key, value, params, n_heads, *,
                         compute_dtype=jnp.bfloat16,
                         approx_softmax_recip=True,
                         attn_dtype=None,
                         q_tile=128):
    """query/key/value: [B, S, H] float32.  params: dict of weights/biases.

    Weights are stored as [in, out] (i.e. W.T of the nn.Linear convention),
    biases as [1, H].  Returns (x [B,S,H] in query.dtype,
    attention [B,nh,S,S] in attn_dtype).

    Notes:
      * attn_dtype defaults to compute_dtype (bf16 on the fast path); with
        approx_softmax_recip=True the attention rows sum only approximately to
        1 — pass attn_dtype=jnp.float32 / approx_softmax_recip=False if the
        attention matrix is consumed quantitatively.
      * q_tile: sweep up to 256/512 on v5e/v6e (128 MiB VMEM); keep 64-128 on
        v7x (64 MiB VMEM) at large S.
    """
    B, S, H = query.shape
    assert H % n_heads == 0
    head_dim = H // n_heads
    inv_scale = 1.0 / (float(head_dim) ** 0.5)

    # Query-row tile: bounds VMEM/vreg pressure for realistic S (softmax over
    # the full key axis stays exact).
    tq = S if S <= q_tile else q_tile
    assert S % tq == 0, "seq_len must be a multiple of the query tile"

    if attn_dtype is None:
        attn_dtype = compute_dtype

    # Fold 1/sqrt(head_dim) into the query projection (free, done once) and
    # pre-cast all weights to compute_dtype (halves weight DMA + VMEM, removes
    # per-step in-kernel casts).  Biases stay f32: tiny, and they are added to
    # the f32 MXU accumulator.
    wq_scaled = (params["wq"] * inv_scale).astype(compute_dtype)
    bq_scaled = params["bq"] * inv_scale
    wk = params["wk"].astype(compute_dtype)
    wv = params["wv"].astype(compute_dtype)
    wo = params["wo"].astype(compute_dtype)

    kernel = make_mha_kernel(n_heads, head_dim, compute_dtype, approx_softmax_recip)

    # Weights/biases: constant index_maps (VMEM-resident, never re-DMA'd) and
    # single-buffered — double-buffering an invariant block is pure VMEM waste.
    w_spec = pl.BlockSpec((H, H), lambda b, qt: (0, 0), pipeline_mode=pl.Buffered(1))
    b_spec = pl.BlockSpec((1, H), lambda b, qt: (0, 0), pipeline_mode=pl.Buffered(1))
    q_spec = pl.BlockSpec((1, tq, H), lambda b, qt: (b, qt, 0))
    kv_spec = pl.BlockSpec((1, S, H), lambda b, qt: (b, 0, 0))

    # --- VMEM budget -> explicit scoped limit (default 32 MiB is too small at
    # realistic S/H).  Which term dominates tells you what to shrink per chip.
    cd_bytes = jnp.dtype(compute_dtype).itemsize
    attn_bytes = jnp.dtype(attn_dtype).itemsize
    in_bytes = jnp.dtype(query.dtype).itemsize
    vmem_budget = (
        2 * tq * H * in_bytes                     # q input block (double-buffered)
        + 2 * 2 * S * H * in_bytes                # k, v input blocks
        + 4 * H * H * cd_bytes                    # weights (single-buffered)
        + 4 * 2 * H * 4                           # biases
        + 2 * tq * H * in_bytes                   # x output block
        + 2 * n_heads * tq * S * attn_bytes       # attention output block
        + 2 * S * H * cd_bytes                    # K/V projection scratch
        + tq * H * cd_bytes                       # ctx scratch
    )
    vmem_limit = int(vmem_budget * 1.3) + (4 << 20)      # margin for compiler scratch
    vmem_limit = max(32 << 20, min(vmem_limit, 127 << 20))

    # --- Cost estimate: the kernel is writeback-dominated (nh*S^2 attention),
    # not FLOP-dominated; tell XLA so it can schedule neighbours around it.
    cost = pl.CostEstimate(
        flops=2 * B * S * H * (4 * H + 2 * S),
        transcendentals=B * n_heads * S * S,
        bytes_accessed=(3 * B * S * H * in_bytes + 4 * H * H * cd_bytes
                        + 8 * H * 4 + B * S * H * in_bytes
                        + B * n_heads * S * S * attn_bytes),
    )

    out_x, out_attn = pl.pallas_call(
        kernel,
        out_shape=(
            jax.ShapeDtypeStruct((B, S, H), query.dtype),
            jax.ShapeDtypeStruct((B, n_heads, S, S), attn_dtype),
        ),
        grid_spec=pltpu.PrefetchScalarGridSpec(
            num_scalar_prefetch=0,
            grid=(B, S // tq),
            in_specs=[
                q_spec, kv_spec, kv_spec,              # query, key, value
                w_spec, b_spec,                        # Wq (pre-scaled), bq
                w_spec, b_spec,                        # Wk, bk
                w_spec, b_spec,                        # Wv, bv
                w_spec, b_spec,                        # Wo, bo
            ],
            out_specs=[
                pl.BlockSpec((1, tq, H), lambda b, qt: (b, qt, 0)),
                pl.BlockSpec((1, n_heads, tq, S), lambda b, qt: (b, 0, qt, 0)),
            ],
            scratch_shapes=[
                pltpu.VMEM((S, H), compute_dtype),   # K projection (per batch elt)
                pltpu.VMEM((S, H), compute_dtype),   # V projection (per batch elt)
                pltpu.VMEM((tq, H), compute_dtype),  # concatenated per-head context
            ],
        ),
        compiler_params=pltpu.CompilerParams(
            # Batch axis parallel (2 TCs on v7x); the query-tile axis carries
            # the per-batch K/V scratch so it MUST stay "arbitrary"/sequential.
            dimension_semantics=("parallel", "arbitrary"),
            vmem_limit_bytes=vmem_limit),
        cost_estimate=cost,
    )(query, key, value,
      wq_scaled, bq_scaled,
      wk, params["bk"],
      wv, params["bv"],
      wo, params["bo"])

    return out_x, out_attn


def reference_mha(query, key, value, params, n_heads):
    """Pure-JAX reference mirroring the PyTorch forward (mask=None, eval)."""
    B, S, H = query.shape
    dh = H // n_heads
    scale = jnp.sqrt(jnp.float32(dh))

    def proj(x, w, b):
        return x @ w + b[0]

    Q = proj(query, params["wq"], params["bq"])
    K = proj(key, params["wk"], params["bk"])
    V = proj(value, params["wv"], params["bv"])

    def split(x):
        return x.reshape(B, S, n_heads, dh).transpose(0, 2, 1, 3)

    Qh, Kh, Vh = split(Q), split(K), split(V)
    energy = jnp.einsum("bhqd,bhkd->bhqk", Qh, Kh) / scale
    attn = jax.nn.softmax(energy, axis=-1)
    x = jnp.einsum("bhqk,bhkd->bhqd", attn, Vh)
    x = x.transpose(0, 2, 1, 3).reshape(B, S, H)
    x = x @ params["wo"] + params["bo"][0]
    return x, attn


if __name__ == "__main__":
    B, S, H, n_heads = 2, 8, 32, 4

    key0 = jax.random.PRNGKey(0)
    ks = jax.random.split(key0, 11)

    # Deterministic parameter init (weights stored as [in, out], i.e. W.T of
    # the PyTorch nn.Linear convention).
    def winit(k):
        return jax.random.normal(k, (H, H), dtype=jnp.float32) * 0.1

    def binit(k):
        return jax.random.normal(k, (1, H), dtype=jnp.float32) * 0.1

    params = {
        "wq": winit(ks[0]), "bq": binit(ks[1]),
        "wk": winit(ks[2]), "bk": binit(ks[3]),
        "wv": winit(ks[4]), "bv": binit(ks[5]),
        "wo": winit(ks[6]), "bo": binit(ks[7]),
    }

    query = jax.random.normal(ks[8], (B, S, H), dtype=jnp.float32)
    key_in = jax.random.normal(ks[9], (B, S, H), dtype=jnp.float32)
    value = jax.random.normal(ks[10], (B, S, H), dtype=jnp.float32)

    x_ref, attn_ref_vals = reference_mha(query, key_in, value, params, n_heads)

    # 1) f32 / exact-reciprocal / f32-attention path: matches PyTorch numerics.
    x32, a32 = multi_head_attention(query, key_in, value, params, n_heads,
                                    compute_dtype=jnp.float32,
                                    approx_softmax_recip=False,
                                    attn_dtype=jnp.float32)
    jax.block_until_ready((x32, a32))
    assert jnp.allclose(x32, x_ref, atol=2e-4, rtol=2e-4), "f32 x mismatch"
    assert jnp.allclose(a32, attn_ref_vals, atol=2e-4, rtol=2e-4), "f32 attn mismatch"

    # 2) Fast path: bf16 weights/scratch/attention output, f32 accumulation,
    #    approx reciprocal -> relaxed tolerance vs f32 reference.
    xbf, abf = multi_head_attention(query, key_in, value, params, n_heads)
    jax.block_until_ready((xbf, abf))
    assert jnp.allclose(xbf, x_ref, atol=5e-2, rtol=5e-2), "bf16 x mismatch"
    assert jnp.allclose(abf.astype(jnp.float32), attn_ref_vals,
                        atol=3e-2, rtol=3e-2), "bf16 attn mismatch"

    print("KERNEL_OK")
</pallas_src>

<mosaic_0001>
module attributes {stable_mosaic.version = 11 : i64} {
  func.func @kernel(%arg0: i32, %arg1: i32, %arg2: memref<1x8x32xf32, #tpu.memory_space<vmem>>, %arg3: memref<1x8x32xf32, #tpu.memory_space<vmem>>, %arg4: memref<1x8x32xf32, #tpu.memory_space<vmem>>, %arg5: memref<32x32xf32, #tpu.memory_space<vmem>>, %arg6: memref<1x32xf32, #tpu.memory_space<vmem>>, %arg7: memref<32x32xf32, #tpu.memory_space<vmem>>, %arg8: memref<1x32xf32, #tpu.memory_space<vmem>>, %arg9: memref<32x32xf32, #tpu.memory_space<vmem>>, %arg10: memref<1x32xf32, #tpu.memory_space<vmem>>, %arg11: memref<32x32xf32, #tpu.memory_space<vmem>>, %arg12: memref<1x32xf32, #tpu.memory_space<vmem>>, %arg13: memref<1x8x32xf32, #tpu.memory_space<vmem>>, %arg14: memref<1x4x8x8xf32, #tpu.memory_space<vmem>>, %arg15: memref<8x32xf32, #tpu.memory_space<vmem>>, %arg16: memref<8x32xf32, #tpu.memory_space<vmem>>, %arg17: memref<8x32xf32, #tpu.memory_space<vmem>>) attributes {dimension_semantics = [#tpu.dimension_semantics<parallel>, #tpu.dimension_semantics<arbitrary>], iteration_bounds = array<i64: 2, 1>, scalar_prefetch = 0 : i64, scratch_operands = 3 : i64, tpu.core_type = #tpu.core_type<tc>, window_params = [{transform_indices = @transform_0, window_bounds = array<i64: 1, 8, 32>}, {transform_indices = @transform_1, window_bounds = array<i64: 1, 8, 32>}, {transform_indices = @transform_2, window_bounds = array<i64: 1, 8, 32>}, {pipeline_mode = #tpu.pipeline_mode<synchronous>, transform_indices = @transform_3, window_bounds = array<i64: 32, 32>}, {pipeline_mode = #tpu.pipeline_mode<synchronous>, transform_indices = @transform_4, window_bounds = array<i64: 1, 32>}, {pipeline_mode = #tpu.pipeline_mode<synchronous>, transform_indices = @transform_5, window_bounds = array<i64: 32, 32>}, {pipeline_mode = #tpu.pipeline_mode<synchronous>, transform_indices = @transform_6, window_bounds = array<i64: 1, 32>}, {pipeline_mode = #tpu.pipeline_mode<synchronous>, transform_indices = @transform_7, window_bounds = array<i64: 32, 32>}, {pipeline_mode = #tpu.pipeline_mode<synchronous>, transform_indices = @transform_8, window_bounds = array<i64: 1, 32>}, {pipeline_mode = #tpu.pipeline_mode<synchronous>, transform_indices = @transform_9, window_bounds = array<i64: 32, 32>}, {pipeline_mode = #tpu.pipeline_mode<synchronous>, transform_indices = @transform_10, window_bounds = array<i64: 1, 32>}, {transform_indices = @transform_11, window_bounds = array<i64: 1, 8, 32>}, {transform_indices = @transform_12, window_bounds = array<i64: 1, 4, 8, 8>}]} {
    %c0_i32 = arith.constant 0 : i32
    %0 = arith.cmpi eq, %arg1, %c0_i32 : i32
    %1 = arith.extui %0 : i1 to i32
    %c0_i32_0 = arith.constant 0 : i32
    %2 = arith.cmpi ne, %1, %c0_i32_0 : i32
    scf.if %2 {
      %c0_67 = arith.constant 0 : index
      %c0_68 = arith.constant 0 : index
      %c0_69 = arith.constant 0 : index
      %95 = vector.load %arg3[%c0_67, %c0_68, %c0_69] : memref<1x8x32xf32, #tpu.memory_space<vmem>>, vector<1x8x32xf32>
      %96 = vector.shape_cast %95 : vector<1x8x32xf32> to vector<8x32xf32>
      %c0_70 = arith.constant 0 : index
      %c0_71 = arith.constant 0 : index
      %c0_72 = arith.constant 0 : index
      %97 = vector.load %arg4[%c0_70, %c0_71, %c0_72] : memref<1x8x32xf32, #tpu.memory_space<vmem>>, vector<1x8x32xf32>
      %98 = vector.shape_cast %97 : vector<1x8x32xf32> to vector<8x32xf32>
      %c0_73 = arith.constant 0 : index
      %c0_74 = arith.constant 0 : index
      %99 = vector.load %arg7[%c0_73, %c0_74] : memref<32x32xf32, #tpu.memory_space<vmem>>, vector<32x32xf32>
      %cst_75 = arith.constant dense<0.000000e+00> : vector<8x32xf32>
      %100 = tpu.matmul %96, %99, %cst_75 {dimension_numbers = #tpu.dot_dimension_numbers<[1], [0], [0], [1], [0, 0, 1, 1], [], []>} : vector<8x32xf32>, vector<32x32xf32>, vector<8x32xf32> -> vector<8x32xf32>
      %c0_76 = arith.constant 0 : index
      %c0_77 = arith.constant 0 : index
      %101 = vector.load %arg8[%c0_76, %c0_77] : memref<1x32xf32, #tpu.memory_space<vmem>>, vector<1x32xf32>
      %102 = vector.broadcast %101 : vector<1x32xf32> to vector<8x32xf32>
      %103 = arith.addf %100, %102 : vector<8x32xf32>
      %c0_78 = arith.constant 0 : index
      %c0_79 = arith.constant 0 : index
      %104 = vector.load %arg15[%c0_78, %c0_79] : memref<8x32xf32, #tpu.memory_space<vmem>>, vector<8x32xf32>
      tpu.vector_store %arg15[%c0_78, %c0_79], %103 {strides = array<i32>} : memref<8x32xf32, #tpu.memory_space<vmem>>, vector<8x32xf32>,
      %c0_80 = arith.constant 0 : index
      %c0_81 = arith.constant 0 : index
      %105 = vector.load %arg9[%c0_80, %c0_81] : memref<32x32xf32, #tpu.memory_space<vmem>>, vector<32x32xf32>
      %cst_82 = arith.constant dense<0.000000e+00> : vector<8x32xf32>
      %106 = tpu.matmul %98, %105, %cst_82 {dimension_numbers = #tpu.dot_dimension_numbers<[1], [0], [0], [1], [0, 0, 1, 1], [], []>} : vector<8x32xf32>, vector<32x32xf32>, vector<8x32xf32> -> vector<8x32xf32>
      %c0_83 = arith.constant 0 : index
      %c0_84 = arith.constant 0 : index
      %107 = vector.load %arg10[%c0_83, %c0_84] : memref<1x32xf32, #tpu.memory_space<vmem>>, vector<1x32xf32>
      %108 = vector.broadcast %107 : vector<1x32xf32> to vector<8x32xf32>
      %109 = arith.addf %106, %108 : vector<8x32xf32>
      %c0_85 = arith.constant 0 : index
      %c0_86 = arith.constant 0 : index
      %110 = vector.load %arg16[%c0_85, %c0_86] : memref<8x32xf32, #tpu.memory_space<vmem>>, vector<8x32xf32>
      tpu.vector_store %arg16[%c0_85, %c0_86], %109 {strides = array<i32>} : memref<8x32xf32, #tpu.memory_space<vmem>>, vector<8x32xf32>,
    } else {
    }
    %c0 = arith.constant 0 : index
    %c0_1 = arith.constant 0 : index
    %c0_2 = arith.constant 0 : index
    %3 = vector.load %arg2[%c0, %c0_1, %c0_2] : memref<1x8x32xf32, #tpu.memory_space<vmem>>, vector<1x8x32xf32>
    %4 = vector.shape_cast %3 : vector<1x8x32xf32> to vector<8x32xf32>
    %c0_3 = arith.constant 0 : index
    %c0_4 = arith.constant 0 : index
    %5 = vector.load %arg5[%c0_3, %c0_4] : memref<32x32xf32, #tpu.memory_space<vmem>>, vector<32x32xf32>
    %cst = arith.constant dense<0.000000e+00> : vector<8x32xf32>
    %6 = tpu.matmul %4, %5, %cst {dimension_numbers = #tpu.dot_dimension_numbers<[1], [0], [0], [1], [0, 0, 1, 1], [], []>} : vector<8x32xf32>, vector<32x32xf32>, vector<8x32xf32> -> vector<8x32xf32>
    %c0_5 = arith.constant 0 : index
    %c0_6 = arith.constant 0 : index
    %7 = vector.load %arg6[%c0_5, %c0_6] : memref<1x32xf32, #tpu.memory_space<vmem>>, vector<1x32xf32>
    %8 = vector.broadcast %7 : vector<1x32xf32> to vector<8x32xf32>
    %9 = arith.addf %6, %8 : vector<8x32xf32>
    %10 = vector.extract_strided_slice %9 {offsets = [0, 0], sizes = [8, 8], strides = [1, 1]} : vector<8x32xf32> to vector<8x8xf32>
    %c0_7 = arith.constant 0 : index
    %c0_8 = arith.constant 0 : index
    %11 = vector.load %arg15[%c0_7, %c0_8] : memref<8x32xf32, #tpu.memory_space<vmem>>, vector<8x8xf32>
    %c0_9 = arith.constant 0 : index
    %c0_10 = arith.constant 0 : index
    %12 = vector.load %arg16[%c0_9, %c0_10] : memref<8x32xf32, #tpu.memory_space<vmem>>, vector<8x8xf32>
    %cst_11 = arith.constant dense<0.000000e+00> : vector<8x8xf32>
    %13 = tpu.matmul %10, %11, %cst_11 {dimension_numbers = #tpu.dot_dimension_numbers<[1], [1], [0], [0], [0, 0, 1, 0], [], []>} : vector<8x8xf32>, vector<8x8xf32>, vector<8x8xf32> -> vector<8x8xf32>
    %cst_12 = arith.constant dense<0xFF800000> : vector<8xf32>
    %14 = vector.multi_reduction <maximumf>, %13, %cst_12 [1] : vector<8x8xf32> to vector<8xf32>
    %15 = vector.shape_cast %14 : vector<8xf32> to vector<8x1xf32>
    %16 = vector.broadcast %15 : vector<8x1xf32> to vector<8x8xf32>
    %17 = arith.subf %13, %16 : vector<8x8xf32>
    %18 = math.exp %17 : vector<8x8xf32>
    %cst_13 = arith.constant dense<0.000000e+00> : vector<8xf32>
    %19 = vector.multi_reduction <add>, %18, %cst_13 [1] : vector<8x8xf32> to vector<8xf32>
    %20 = vector.shape_cast %19 : vector<8xf32> to vector<8x1xf32>
    %21 = tpu.reciprocal %20 : vector<8x1xf32> -> vector<8x1xf32>
    %22 = vector.broadcast %21 : vector<8x1xf32> to vector<8x8xf32>
    %23 = arith.mulf %18, %22 : vector<8x8xf32>
    %c0_14 = arith.constant 0 : index
    %c0_15 = arith.constant 0 : index
    %c0_16 = arith.constant 0 : index
    %c0_17 = arith.constant 0 : index
    %24 = vector.load %arg14[%c0_14, %c0_15, %c0_16, %c0_17] : memref<1x4x8x8xf32, #tpu.memory_space<vmem>>, vector<1x1x8x8xf32>
    %25 = vector.shape_cast %24 : vector<1x1x8x8xf32> to vector<8x8xf32>
    %26 = vector.shape_cast %23 : vector<8x8xf32> to vector<1x1x8x8xf32>
    tpu.vector_store %arg14[%c0_14, %c0_15, %c0_16, %c0_17], %26 {strides = array<i32>} : memref<1x4x8x8xf32, #tpu.memory_space<vmem>>, vector<1x1x8x8xf32>,
    %cst_18 = arith.constant dense<0.000000e+00> : vector<8x8xf32>
    %27 = tpu.matmul %23, %12, %cst_18 {dimension_numbers = #tpu.dot_dimension_numbers<[1], [0], [0], [1], [0, 0, 1, 1], [], []>} : vector<8x8xf32>, vector<8x8xf32>, vector<8x8xf32> -> vector<8x8xf32>
    %c0_19 = arith.constant 0 : index
    %c0_20 = arith.constant 0 : index
    %28 = vector.load %arg17[%c0_19, %c0_20] : memref<8x32xf32, #tpu.memory_space<vmem>>, vector<8x8xf32>
    tpu.vector_store %arg17[%c0_19, %c0_20], %27 {strides = array<i32>} : memref<8x32xf32, #tpu.memory_space<vmem>>, vector<8x8xf32>,
    %29 = vector.extract_strided_slice %9 {offsets = [0, 8], sizes = [8, 8], strides = [1, 1]} : vector<8x32xf32> to vector<8x8xf32>
    %c0_21 = arith.constant 0 : index
    %c8 = arith.constant 8 : index
    %30 = vector.load %arg15[%c0_21, %c8] : memref<8x32xf32, #tpu.memory_space<vmem>>, vector<8x8xf32>
    %c0_22 = arith.constant 0 : index
    %c8_23 = arith.constant 8 : index
    %31 = vector.load %arg16[%c0_22, %c8_23] : memref<8x32xf32, #tpu.memory_space<vmem>>, vector<8x8xf32>
    %cst_24 = arith.constant dense<0.000000e+00> : vector<8x8xf32>
    %32 = tpu.matmul %29, %30, %cst_24 {dimension_numbers = #tpu.dot_dimension_numbers<[1], [1], [0], [0], [0, 0, 1, 0], [], []>} : vector<8x8xf32>, vector<8x8xf32>, vector<8x8xf32> -> vector<8x8xf32>
    %cst_25 = arith.constant dense<0xFF800000> : vector<8xf32>
    %33 = vector.multi_reduction <maximumf>, %32, %cst_25 [1] : vector<8x8xf32> to vector<8xf32>
    %34 = vector.shape_cast %33 : vector<8xf32> to vector<8x1xf32>
    %35 = vector.broadcast %34 : vector<8x1xf32> to vector<8x8xf32>
    %36 = arith.subf %32, %35 : vector<8x8xf32>
    %37 = math.exp %36 : vector<8x8xf32>
    %cst_26 = arith.constant dense<0.000000e+00> : vector<8xf32>
    %38 = vector.multi_reduction <add>, %37, %cst_26 [1] : vector<8x8xf32> to vector<8xf32>
    %39 = vector.shape_cast %38 : vector<8xf32> to vector<8x1xf32>
    %40 = tpu.reciprocal %39 : vector<8x1xf32> -> vector<8x1xf32>
    %41 = vector.broadcast %40 : vector<8x1xf32> to vector<8x8xf32>
    %42 = arith.mulf %37, %41 : vector<8x8xf32>
    %c0_27 = arith.constant 0 : index
    %c1 = arith.constant 1 : index
    %c0_28 = arith.constant 0 : index
    %c0_29 = arith.constant 0 : index
    %43 = vector.load %arg14[%c0_27, %c1, %c0_28, %c0_29] : memref<1x4x8x8xf32, #tpu.memory_space<vmem>>, vector<1x1x8x8xf32>
    %44 = vector.shape_cast %43 : vector<1x1x8x8xf32> to vector<8x8xf32>
    %45 = vector.shape_cast %42 : vector<8x8xf32> to vector<1x1x8x8xf32>
    tpu.vector_store %arg14[%c0_27, %c1, %c0_28, %c0_29], %45 {strides = array<i32>} : memref<1x4x8x8xf32, #tpu.memory_space<vmem>>, vector<1x1x8x8xf32>,
    %cst_30 = arith.constant dense<0.000000e+00> : vector<8x8xf32>
    %46 = tpu.matmul %42, %31, %cst_30 {dimension_numbers = #tpu.dot_dimension_numbers<[1], [0], [0], [1], [0, 0, 1, 1], [], []>} : vector<8x8xf32>, vector<8x8xf32>, vector<8x8xf32> -> vector<8x8xf32>
    %c0_31 = arith.constant 0 : index
    %c8_32 = arith.constant 8 : index
    %47 = vector.load %arg17[%c0_31, %c8_32] : memref<8x32xf32, #tpu.memory_space<vmem>>, vector<8x8xf32>
    tpu.vector_store %arg17[%c0_31, %c8_32], %46 {strides = array<i32>} : memref<8x32xf32, #tpu.memory_space<vmem>>, vector<8x8xf32>,
    %48 = vector.extract_strided_slice %9 {offsets = [0, 16], sizes = [8, 8], strides = [1, 1]} : vector<8x32xf32> to vector<8x8xf32>
    %c0_33 = arith.constant 0 : index
    %c16 = arith.constant 16 : index
    %49 = vector.load %arg15[%c0_33, %c16] : memref<8x32xf32, #tpu.memory_space<vmem>>, vector<8x8xf32>
    %c0_34 = arith.constant 0 : index
    %c16_35 = arith.constant 16 : index
    %50 = vector.load %arg16[%c0_34, %c16_35] : memref<8x32xf32, #tpu.memory_space<vmem>>, vector<8x8xf32>
    %cst_36 = arith.constant dense<0.000000e+00> : vector<8x8xf32>
    %51 = tpu.matmul %48, %49, %cst_36 {dimension_numbers = #tpu.dot_dimension_numbers<[1], [1], [0], [0], [0, 0, 1, 0], [], []>} : vector<8x8xf32>, vector<8x8xf32>, vector<8x8xf32> -> vector<8x8xf32>
    %cst_37 = arith.constant dense<0xFF800000> : vector<8xf32>
    %52 = vector.multi_reduction <maximumf>, %51, %cst_37 [1] : vector<8x8xf32> to vector<8xf32>
    %53 = vector.shape_cast %52 : vector<8xf32> to vector<8x1xf32>
    %54 = vector.broadcast %53 : vector<8x1xf32> to vector<8x8xf32>
    %55 = arith.subf %51, %54 : vector<8x8xf32>
    %56 = math.exp %55 : vector<8x8xf32>
    %cst_38 = arith.constant dense<0.000000e+00> : vector<8xf32>
    %57 = vector.multi_reduction <add>, %56, %cst_38 [1] : vector<8x8xf32> to vector<8xf32>
    %58 = vector.shape_cast %57 : vector<8xf32> to vector<8x1xf32>
    %59 = tpu.reciprocal %58 : vector<8x1xf32> -> vector<8x1xf32>
    %60 = vector.broadcast %59 : vector<8x1xf32> to vector<8x8xf32>
    %61 = arith.mulf %56, %60 : vector<8x8xf32>
    %c0_39 = arith.constant 0 : index
    %c2 = arith.constant 2 : index
    %c0_40 = arith.constant 0 : index
    %c0_41 = arith.constant 0 : index
    %62 = vector.load %arg14[%c0_39, %c2, %c0_40, %c0_41] : memref<1x4x8x8xf32, #tpu.memory_space<vmem>>, vector<1x1x8x8xf32>
    %63 = vector.shape_cast %62 : vector<1x1x8x8xf32> to vector<8x8xf32>
    %64 = vector.shape_cast %61 : vector<8x8xf32> to vector<1x1x8x8xf32>
    tpu.vector_store %arg14[%c0_39, %c2, %c0_40, %c0_41], %64 {strides = array<i32>} : memref<1x4x8x8xf32, #tpu.memory_space<vmem>>, vector<1x1x8x8xf32>,
    %cst_42 = arith.constant dense<0.000000e+00> : vector<8x8xf32>
    %65 = tpu.matmul %61, %50, %cst_42 {dimension_numbers = #tpu.dot_dimension_numbers<[1], [0], [0], [1], [0, 0, 1, 1], [], []>} : vector<8x8xf32>, vector<8x8xf32>, vector<8x8xf32> -> vector<8x8xf32>
    %c0_43 = arith.constant 0 : index
    %c16_44 = arith.constant 16 : index
    %66 = vector.load %arg17[%c0_43, %c16_44] : memref<8x32xf32, #tpu.memory_space<vmem>>, vector<8x8xf32>
    tpu.vector_store %arg17[%c0_43, %c16_44], %65 {strides = array<i32>} : memref<8x32xf32, #tpu.memory_space<vmem>>, vector<8x8xf32>,
    %67 = vector.extract_strided_slice %9 {offsets = [0, 24], sizes = [8, 8], strides = [1, 1]} : vector<8x32xf32> to vector<8x8xf32>
    %c0_45 = arith.constant 0 : index
    %c24 = arith.constant 24 : index
    %68 = vector.load %arg15[%c0_45, %c24] : memref<8x32xf32, #tpu.memory_space<vmem>>, vector<8x8xf32>
    %c0_46 = arith.constant 0 : index
    %c24_47 = arith.constant 24 : index
    %69 = vector.load %arg16[%c0_46, %c24_47] : memref<8x32xf32, #tpu.memory_space<vmem>>, vector<8x8xf32>
    %cst_48 = arith.constant dense<0.000000e+00> : vector<8x8xf32>
    %70 = tpu.matmul %67, %68, %cst_48 {dimension_numbers = #tpu.dot_dimension_numbers<[1], [1], [0], [0], [0, 0, 1, 0], [], []>} : vector<8x8xf32>, vector<8x8xf32>, vector<8x8xf32> -> vector<8x8xf32>
    %cst_49 = arith.constant dense<0xFF800000> : vector<8xf32>
    %71 = vector.multi_reduction <maximumf>, %70, %cst_49 [1] : vector<8x8xf32> to vector<8xf32>
    %72 = vector.shape_cast %71 : vector<8xf32> to vector<8x1xf32>
    %73 = vector.broadcast %72 : vector<8x1xf32> to vector<8x8xf32>
    %74 = arith.subf %70, %73 : vector<8x8xf32>
    %75 = math.exp %74 : vector<8x8xf32>
    %cst_50 = arith.constant dense<0.000000e+00> : vector<8xf32>
    %76 = vector.multi_reduction <add>, %75, %cst_50 [1] : vector<8x8xf32> to vector<8xf32>
    %77 = vector.shape_cast %76 : vector<8xf32> to vector<8x1xf32>
    %78 = tpu.reciprocal %77 : vector<8x1xf32> -> vector<8x1xf32>
    %79 = vector.broadcast %78 : vector<8x1xf32> to vector<8x8xf32>
    %80 = arith.mulf %75, %79 : vector<8x8xf32>
    %c0_51 = arith.constant 0 : index
    %c3 = arith.constant 3 : index
    %c0_52 = arith.constant 0 : index
    %c0_53 = arith.constant 0 : index
    %81 = vector.load %arg14[%c0_51, %c3, %c0_52, %c0_53] : memref<1x4x8x8xf32, #tpu.memory_space<vmem>>, vector<1x1x8x8xf32>
    %82 = vector.shape_cast %81 : vector<1x1x8x8xf32> to vector<8x8xf32>
    %83 = vector.shape_cast %80 : vector<8x8xf32> to vector<1x1x8x8xf32>
    tpu.vector_store %arg14[%c0_51, %c3, %c0_52, %c0_53], %83 {strides = array<i32>} : memref<1x4x8x8xf32, #tpu.memory_space<vmem>>, vector<1x1x8x8xf32>,
    %cst_54 = arith.constant dense<0.000000e+00> : vector<8x8xf32>
    %84 = tpu.matmul %80, %69, %cst_54 {dimension_numbers = #tpu.dot_dimension_numbers<[1], [0], [0], [1], [0, 0, 1, 1], [], []>} : vector<8x8xf32>, vector<8x8xf32>, vector<8x8xf32> -> vector<8x8xf32>
    %c0_55 = arith.constant 0 : index
    %c24_56 = arith.constant 24 : index
    %85 = vector.load %arg17[%c0_55, %c24_56] : memref<8x32xf32, #tpu.memory_space<vmem>>, vector<8x8xf32>
    tpu.vector_store %arg17[%c0_55, %c24_56], %84 {strides = array<i32>} : memref<8x32xf32, #tpu.memory_space<vmem>>, vector<8x8xf32>,
    %c0_57 = arith.constant 0 : index
    %c0_58 = arith.constant 0 : index
    %86 = vector.load %arg17[%c0_57, %c0_58] : memref<8x32xf32, #tpu.memory_space<vmem>>, vector<8x32xf32>
    %c0_59 = arith.constant 0 : index
    %c0_60 = arith.constant 0 : index
    %87 = vector.load %arg11[%c0_59, %c0_60] : memref<32x32xf32, #tpu.memory_space<vmem>>, vector<32x32xf32>
    %cst_61 = arith.constant dense<0.000000e+00> : vector<8x32xf32>
    %88 = tpu.matmul %86, %87, %cst_61 {dimension_numbers = #tpu.dot_dimension_numbers<[1], [0], [0], [1], [0, 0, 1, 1], [], []>} : vector<8x32xf32>, vector<32x32xf32>, vector<8x32xf32> -> vector<8x32xf32>
    %c0_62 = arith.constant 0 : index
    %c0_63 = arith.constant 0 : index
    %89 = vector.load %arg12[%c0_62, %c0_63] : memref<1x32xf32, #tpu.memory_space<vmem>>, vector<1x32xf32>
    %90 = vector.broadcast %89 : vector<1x32xf32> to vector<8x32xf32>
    %91 = arith.addf %88, %90 : vector<8x32xf32>
    %c0_64 = arith.constant 0 : index
    %c0_65 = arith.constant 0 : index
    %c0_66 = arith.constant 0 : index
    %92 = vector.load %arg13[%c0_64, %c0_65, %c0_66] : memref<1x8x32xf32, #tpu.memory_space<vmem>>, vector<1x8x32xf32>
    %93 = vector.shape_cast %92 : vector<1x8x32xf32> to vector<8x32xf32>
    %94 = vector.shape_cast %91 : vector<8x32xf32> to vector<1x8x32xf32>
    tpu.vector_store %arg13[%c0_64, %c0_65, %c0_66], %94 {strides = array<i32>} : memref<1x8x32xf32, #tpu.memory_space<vmem>>, vector<1x8x32xf32>,
    return
  }
  func.func @transform_0(%arg0: i32, %arg1: i32) -> (i32, i32, i32) {
    %c0_i32 = arith.constant 0 : i32
    %c0_i32_0 = arith.constant 0 : i32
    return %arg0, %arg1, %c0_i32 : i32, i32, i32
  }
  func.func @transform_1(%arg0: i32, %arg1: i32) -> (i32, i32, i32) {
    %c0_i32 = arith.constant 0 : i32
    %c0_i32_0 = arith.constant 0 : i32
    %c0_i32_1 = arith.constant 0 : i32
    return %arg0, %c0_i32, %c0_i32_0 : i32, i32, i32
  }
  func.func @transform_2(%arg0: i32, %arg1: i32) -> (i32, i32, i32) {
    %c0_i32 = arith.constant 0 : i32
    %c0_i32_0 = arith.constant 0 : i32
    %c0_i32_1 = arith.constant 0 : i32
    return %arg0, %c0_i32, %c0_i32_0 : i32, i32, i32
  }
  func.func @transform_3(%arg0: i32, %arg1: i32) -> (i32, i32) {
    %c0_i32 = arith.constant 0 : i32
    %c0_i32_0 = arith.constant 0 : i32
    %c0_i32_1 = arith.constant 0 : i32
    return %c0_i32, %c0_i32_0 : i32, i32
  }
  func.func @transform_4(%arg0: i32, %arg1: i32) -> (i32, i32) {
    %c0_i32 = arith.constant 0 : i32
    %c0_i32_0 = arith.constant 0 : i32
    %c0_i32_1 = arith.constant 0 : i32
    return %c0_i32, %c0_i32_0 : i32, i32
  }
  func.func @transform_5(%arg0: i32, %arg1: i32) -> (i32, i32) {
    %c0_i32 = arith.constant 0 : i32
    %c0_i32_0 = arith.constant 0 : i32
    %c0_i32_1 = arith.constant 0 : i32
    return %c0_i32, %c0_i32_0 : i32, i32
  }
  func.func @transform_6(%arg0: i32, %arg1: i32) -> (i32, i32) {
    %c0_i32 = arith.constant 0 : i32
    %c0_i32_0 = arith.constant 0 : i32
    %c0_i32_1 = arith.constant 0 : i32
    return %c0_i32, %c0_i32_0 : i32, i32
  }
  func.func @transform_7(%arg0: i32, %arg1: i32) -> (i32, i32) {
    %c0_i32 = arith.constant 0 : i32
    %c0_i32_0 = arith.constant 0 : i32
    %c0_i32_1 = arith.constant 0 : i32
    return %c0_i32, %c0_i32_0 : i32, i32
  }
  func.func @transform_8(%arg0: i32, %arg1: i32) -> (i32, i32) {
    %c0_i32 = arith.constant 0 : i32
    %c0_i32_0 = arith.constant 0 : i32
    %c0_i32_1 = arith.constant 0 : i32
    return %c0_i32, %c0_i32_0 : i32, i32
  }
  func.func @transform_9(%arg0: i32, %arg1: i32) -> (i32, i32) {
    %c0_i32 = arith.constant 0 : i32
    %c0_i32_0 = arith.constant 0 : i32
    %c0_i32_1 = arith.constant 0 : i32
    return %c0_i32, %c0_i32_0 : i32, i32
  }
  func.func @transform_10(%arg0: i32, %arg1: i32) -> (i32, i32) {
    %c0_i32 = arith.constant 0 : i32
    %c0_i32_0 = arith.constant 0 : i32
    %c0_i32_1 = arith.constant 0 : i32
    return %c0_i32, %c0_i32_0 : i32, i32
  }
  func.func @transform_11(%arg0: i32, %arg1: i32) -> (i32, i32, i32) {
    %c0_i32 = arith.constant 0 : i32
    %c0_i32_0 = arith.constant 0 : i32
    return %arg0, %arg1, %c0_i32 : i32, i32, i32
  }
  func.func @transform_12(%arg0: i32, %arg1: i32) -> (i32, i32, i32, i32) {
    %c0_i32 = arith.constant 0 : i32
    %c0_i32_0 = arith.constant 0 : i32
    %c0_i32_1 = arith.constant 0 : i32
    return %arg0, %c0_i32, %arg1, %c0_i32_0 : i32, i32, i32, i32
  }
}

</mosaic_0001>

<bundles_post_ra>
// kernel: tpu_custom_call.1
= control target key start
LH: loop header
LB: loop body
LE: loop exit
PB: predicated region body
PF: predicated region fallthrough
CT: control target
= control target key end

     0   :  { %s3157_s0 = inlined_call_operand.hbm [shape: f32[2,8,32], index: 0, kind: input, shape index: {}]   ;;  %s3158_s1 = inlined_call_operand.hbm [shape: f32[2,8,32], index: 1, kind: input, shape index: {}]   ;;  %s3159_s2 = inlined_call_operand.hbm [shape: f32[2,8,32], index: 2, kind: input, shape index: {}]   ;;  %s3160_s3 = inlined_call_operand.hbm [shape: f32[32,32], index: 3, kind: input, shape index: {}]   ;;  %s3161_s4 = inlined_call_operand.vmem [shape: f32[1,32], index: 4, kind: input, shape index: {}]   ;;  %s3162_s5 = inlined_call_operand.hbm [shape: f32[32,32], index: 5, kind: input, shape index: {}]   ;;  %s3163_s6 = inlined_call_operand.vmem [shape: f32[1,32], index: 6, kind: input, shape index: {}]   ;;  %s3164_s7 = inlined_call_operand.hbm [shape: f32[32,32], index: 7, kind: input, shape index: {}]   ;;  %s3165_s8 = inlined_call_operand.hbm [shape: f32[1,32], index: 8, kind: input, shape index: {}]   ;;  %s3166_s9 = inlined_call_operand.vmem [shape: f32[32,32], index: 9, kind: input, shape index: {}]   ;;  %s3167_s10 = inlined_call_operand.vmem [shape: f32[1,32], index: 10, kind: input, shape index: {}]   ;;  %s3168_s11 = inlined_call_operand.hbm [shape: f32[2,8,32], index: 11, kind: output, shape index: {0}]   ;;  %s3169_s12 = inlined_call_operand.hbm [shape: f32[2,4,8,8], index: 12, kind: output, shape index: {1}]  }
   0x1   :  { %3197 = sst [smem:[#allocation34_spill]] %s3158_s1 }
   0x2   :  { %3198 = sst [smem:[#allocation35_spill]] %s3160_s3 }
   0x3   :  { %3199 = sst [smem:[#allocation36_spill]] %s3164_s7 }
   0x4   :  { %3200 = sst [smem:[#allocation37_spill]] %s3166_s9 }
   0x5   :  { %3201 = sst [smem:[#allocation38_spill]] %s3167_s10 }
   0x6   :  { %3202 = sst [smem:[#allocation39_spill]] %s3168_s11 }
   0x7   :  { %3203 = sst [smem:[#allocation40_spill]] %s3169_s12 }
   0x8   :  { %18 = vsyncpa [#allocation6], 0 }
   0x9   :  { %20 = vsyncpa [#allocation6 + $0x1], 0 }
   0xa   :  { %21 = vsyncpa [#allocation9], 0 }
   0xb   :  { %23 = vsyncpa [#allocation9 + $0x1], 0 }
   0xc   :  { %24 = vsyncpa [#allocation12], 0 }
   0xd   :  { %25 = vsyncpa [#allocation15], 0 }
   0xe   :  { %26 = vsyncpa [#allocation7], 0 }
   0xf   :  { %28 = vsyncpa [#allocation7 + $0x1], 0 }
  0x10   :  { %29 = vsyncpa [#allocation19], 0 }
  0x11   :  { %31 = vsyncpa [#allocation19 + $0x1], 0  ;;  %s2624_s21 = smov 0   ;;  %s2626_s22 = smov 0  }
  0x12   :  { %s2628_s23 = smov 0   ;;  %s2630_s24 = smov 0  }
  0x13   :  { %s2632_s25 = smov 0   ;;  %s2634_s26 = smov 0  }
  0x14 LB: > { %3204 = sst [smem:[#allocation26_spill]] %s2516_s21  ;;  %s2655_s27 = sadd.s32 4294967295, %s2536_s26   ;;  %s2536_s26 = sphi %s2634_s26, %s37_s26   ;;  %s2532_s25 = sphi %s2632_s25, %s3253_s25   ;;  %s2528_s24 = sphi %s2630_s24, %s3252_s24   ;;  %s2524_s23 = sphi %s2628_s23, %s3256_s23   ;;  %s2520_s22 = sphi %s2626_s22, %s3255_s22   ;;  %s2516_s21 = sphi %s2624_s21, %s3254_s21  }
  0x15   : > { %3205 = sst [smem:[#allocation27_spill]] %s2528_s24  ;;  %p1865_p0 = scmp.ge.s32.totalorder %s2536_s26, 1 }
  0x16   : > { %3206 = sst [smem:[#allocation28_spill]] %s2532_s25  ;;  %p3181_p1 = scmp.eq.s32.totalorder %s2655_s27, 0 }
  0x17   : > { %3207 = sst [smem:[#allocation29_spill]] %s2536_s26  ;;  %p358_p2 = scmp.lt.s32.totalorder %s2536_s26, 3 }
  0x18   : > { %s2538_s29 = smov [#allocation11]   ;;  %s2539_s14 = smov [#allocation14]  }
  0x19   : > { %p2660_p3 = pnand %p1865_p0, %p358_p2  ;;  %s370_s30 = sshll.u32 %s2538_s29, 4  ;;  %s2664_s30 = int_to_ptr.vmem [resolvable:$true] %s370_s30 }
  0x1a   : > { %s402_s15 = sshll.u32 %s2539_s14, 4  ;;  %s3210_s3 = sld [smem:[#allocation35_spill]]  ;;  %s2675_s15 = int_to_ptr.vmem [resolvable:$true] %s402_s15 }
  0x1b   : > { %s3208_s28 = scalar_select %p2660_p3, 1, 0 }
  0x1c   : > { %p2088_p4 = pneg %p2660_p3 }
  0x1e   : > { %p2671_p6 = pnand %p2088_p4, %p3181_p1 }
  0x20   : > { %s3209_s13 = scalar_select %p2671_p6, 1, 0 }
  0x21   : > { %s2208_s18 = scalar_lea.hbm %s3210_s3, 512  ;;  %p2685_p8 = pneg %p2671_p6 }
  0x22   : > { %p2209_p7 = scmp.ne.s32.totalorder %s3210_s3, %s2208_s18  ;;  %p2215_p11 = scmp.lt.u32.totalorder %s2208_s18, %s3210_s3 }
  0x23   : > { %s3211_s29 = scalar_select %p2685_p8, 1, 0 }
  0x24   : > { %p2211_p9 = pnand %p2685_p8, %p2209_p7 }
  0x26   : > { %p2212_p10 = pneg %p2211_p9 }
  0x28   : > { %p2217_p12 = pnand %p2215_p11, %p2212_p10 }
  0x2a   : > { %2220 = shalt.err (!%p2217_p12)
}
  0x2b   : > { %s2221_s16 = scalar_lea.vmem %s2664_s30, 512  ;;  %p2229_p4 = scmp.lt.s32.totalorder %s2664_s30, %s2664_s30 }
  0x2c   : > { %p2222_p13 = scmp.ne.s32.totalorder %s2664_s30, %s2221_s16  ;;  %p2230_p5 = scmp.lt.s32.totalorder %s2221_s16, %s2221_s16 }
  0x2e   : > { %p2224_p0 = pnand %p2222_p13, %p2685_p8  ;;  %p2231_p7 = por %p2230_p5, %p2229_p4 }
  0x30   : > { %p2225_p2 = pneg %p2224_p0 }
  0x32   : > { %p2232_p9 = pnand %p2231_p7, %p2225_p2 }
  0x34   : > { %2235 = shalt.err (!%p2232_p9)
}
  0x35   : > { %s3174_s17 = smov 128   ;;  %s3175_s11 = smov 8  }
  0x36   : > { %2091 = dma.hbm_to_vmem [thread:$0]  (!%p2671_p6), %s3210_s3, 512, %s2664_s30, [#allocation12], %s3174_s17, %s3174_s17, %s3175_s11  }
  0x37   : > { %s3212_s7 = sld [smem:[#allocation36_spill]] }
  0x3d   : > { %s2236_s16 = scalar_lea.hbm %s3212_s7, 512 }
  0x3e   : > { %p2237_p5 = scmp.ne.s32.totalorder %s3212_s7, %s2236_s16  ;;  %p2243_p12 = scmp.lt.u32.totalorder %s2236_s16, %s3212_s7 }
  0x40   : > { %p2239_p10 = pnand %p2237_p5, %p2685_p8 }
  0x42   : > { %p2240_p11 = pneg %p2239_p10 }
  0x44   : > { %p2245_p13 = pnand %p2243_p12, %p2240_p11 }
  0x46   : > { %2248 = shalt.err (!%p2245_p13)
}
  0x47   : > { %s2249_s30 = scalar_lea.vmem %s2675_s15, 512  ;;  %p2257_p7 = scmp.lt.s32.totalorder %s2675_s15, %s2675_s15 }
  0x48   : > { %p2250_p0 = scmp.ne.s32.totalorder %s2675_s15, %s2249_s30  ;;  %p2258_p9 = scmp.lt.s32.totalorder %s2249_s30, %s2249_s30 }
  0x4a   : > { %p2252_p2 = pnand %p2250_p0, %p2685_p8  ;;  %p2259_p5 = por %p2258_p9, %p2257_p7 }
  0x4c   : > { %p2253_p4 = pneg %p2252_p2 }
  0x4e   : > { %p2260_p10 = pnand %p2259_p5, %p2253_p4 }
  0x50   : > { %2263 = shalt.err (!%p2260_p10)
}
  0x51   : > { %2097 = dma.hbm_to_vmem [thread:$0]  (!%p2671_p6), %s3212_s7, 512, %s2675_s15, [#allocation15], %s3174_s17, %s3174_s17, %s3175_s11  }
  0x52   : > { %s1864_s12 = sadd.s32 4294967294, %s2536_s26   ;;  %s49_s24 = sadd.s32 1, %s2532_s25 }
  0x53   : > { %p51_p11 = scmp.ge.s32.totalorder %s49_s24, 2  ;;  %s58_s18 = sadd.s32 1, %s2524_s23 }
  0x54   : > { %p65_p12 = scmp.ne.s32.totalorder %s2524_s23, %s2520_s22  ;;  %p66_p13 = scmp.eq.s32.totalorder %s2536_s26, 0 }
  0x55   : > { %s3258_s24 = smov (%p51_p11, %s49_s24), 0  ;;  %p71_p2 = scmp.ne.s32.totalorder %s2520_s22, %s2516_s21 }
  0x56   : > { %3213 = sst [smem:[#allocation30_spill]] %s3258_s24  ;;  %p2743_p0 = por %p66_p13, %p65_p12 }
  0x57   : > { %s53_s15 = ssub.s32 %s2532_s25, %s3258_s24  ;;  %p317_p4 = scmp.eq.s32.totalorder %s2655_s27, 1 }
  0x58   : > { %p56_p7 = scmp.eq.s32.totalorder %s53_s15, 0  ;;  %p2754_p9 = por %p3181_p1, %p71_p2 }
  0x59   : > { %p2758_p5 = por %p317_p4, %p65_p12  ;;  %p323_p10 = scmp.eq.s32.totalorder %s1864_s12, 1 }
  0x5a   : > { %s3215_s20 = scalar_select %p2754_p9, 1, 0 }
  0x5b   : > { %s3216_s14 = scalar_select %p2758_p5, 1, 0 }
  0x5c   : > { %s2763_s16 = scalar_select %p56_p7, %s2524_s23, %s58_s18  }
  0x5d   : > { %3217 = sst [smem:[#allocation31_spill]] %s3216_s14  ;;  %p2765_p11 = por %p323_p10, %p71_p2 }
  0x5e   : > { %3218 = sst [smem:[#allocation32_spill]] %s2763_s16  ;;  %p2122_p13 = scmp.lt.s32.totalorder %s2536_s26, 2 }
  0x5f   : > { %s3219_s30 = scalar_select %p2765_p11, 1, 0 }
  0x60   : > { %s3176_s9 = sand.u32 1, %s2524_s23   ;;  %s2772_s10 = sshll.u32 %s2532_s25, 7 }
  0x61   : > { %3220 = sst [smem:[#allocation33_spill]] %s3219_s30  ;;  %s2776_s15 = sshll.u32 %s3176_s9, 3 }
  0x62   : > { %p2780_p12 = pnand %p2122_p13, %p2743_p0  ;;  %s452_s12 = sand.u32 1, %s2536_s26  }
  0x63   : > { %s3222_s1 = sld [smem:[#allocation34_spill]]  ;;  %s456_s7 = scalar_lea.vmem [#allocation8], %s2776_s15 }
  0x64   : > { %s3221_s17 = scalar_select %p2780_p12, 1, 0 }
  0x65   : > { %s463_s9 = sshll.u32 %s456_s7, 4  ;;  %s2794_s19 = scalar_lea.sflag [#allocation9], %s452_s12  ;;  %s2792_s9 = int_to_ptr.vmem [resolvable:$true] %s463_s9 }
  0x66   : > { %p2800_p2 = pneg %p2780_p12 }
  0x68   : > { %s3223_s25 = scalar_select %p2800_p2, 1, 0 }
  0x69   : > { %s2789_s3 = scalar_lea.hbm %s3222_s1, %s2772_s10  ;;  %s2269_s16 = scalar_lea.hbm %s3222_s1, 256 }
  0x6a   : > { %s2264_s24 = scalar_lea.hbm %s2789_s3, 128  ;;  %p2270_p10 = scmp.lt.u32.totalorder %s2789_s3, %s3222_s1 }
  0x6b   : > { %p2265_p0 = scmp.ne.s32.totalorder %s2789_s3, %s2264_s24  ;;  %p2271_p13 = scmp.lt.u32.totalorder %s2269_s16, %s2264_s24 }
  0x6c   : > { %p2273_p11 = scmp.lt.u32.totalorder %s2264_s24, %s2789_s3 }
  0x6d   : > { %p2267_p4 = pnand %p2800_p2, %p2265_p0  ;;  %p2272_p1 = por %p2271_p13, %p2270_p10 }
  0x6f   : > { %p2268_p7 = pneg %p2267_p4  ;;  %p2274_p5 = por %p2273_p11, %p2272_p1 }
  0x71   : > { %p2275_p9 = pnand %p2274_p5, %p2268_p7 }
  0x73   : > { %2278 = shalt.err (!%p2275_p9)
}
  0x74   : > { %s2279_s12 = scalar_lea.vmem %s2792_s9, 128  ;;  %s2542_s11 = smov [#allocation8]  }
  0x75   : > { %p2280_p0 = scmp.ne.s32.totalorder %s2792_s9, %s2279_s12  ;;  %s2284_s18 = sshll.u32 %s2542_s11, 4  ;;  %s2285_s18 = int_to_ptr.vmem [resolvable:$false] %s2284_s18 }
  0x76   : > { %s2286_s26 = scalar_lea.vmem %s2285_s18, 256  ;;  %p2287_p6 = scmp.lt.s32.totalorder %s2792_s9, %s2285_s18 }
  0x77   : > { %p2282_p4 = pnand %p2280_p0, %p2800_p2  ;;  %p2288_p8 = scmp.lt.s32.totalorder %s2286_s26, %s2279_s12 }
  0x79   : > { %p2283_p3 = pneg %p2282_p4  ;;  %p2289_p10 = por %p2288_p8, %p2287_p6 }
  0x7b   : > { %p2290_p13 = pnand %p2289_p10, %p2283_p3 }
  0x7d   : > { %2293 = shalt.err (!%p2290_p13)
}
  0x7e   : > { %2107 = dma.hbm_to_vmem [thread:$0]  (!%p2780_p12), %s2789_s3, 128, %s2792_s9, %s2794_s19  }
  0x7f   : > { %s2543_s24 = smov [#allocation13]   ;;  %s2544_s7 = smov [#allocation16]  }
  0x80   : > { %s386_s16 = sshll.u32 %s2543_s24, 4  ;;  %s416_s1 = sshll.u32 %s2544_s7, 4  ;;  %s387_s16 = int_to_ptr.vmem [resolvable:$true] %s386_s16  ;;  %s417_s1 = int_to_ptr.vmem [resolvable:$true] %s416_s1 }
  0x81   : > { %s2294_s18 = scalar_lea.hbm %s3162_s5, 512  ;;  %p3224_p3 = scmp.ne.s32.totalorder %s3211_s29, 0 }
  0x82   : > { %p2295_p1 = scmp.ne.s32.totalorder %s3162_s5, %s2294_s18  ;;  %p2301_p9 = scmp.lt.u32.totalorder %s2294_s18, %s3162_s5 }
  0x84   : > { %p2297_p6 = pnand %p2295_p1, %p3224_p3 }
  0x86   : > { %p2298_p8 = pneg %p2297_p6 }
  0x88   : > { %p2303_p5 = pnand %p2301_p9, %p2298_p8 }
  0x8a   : > { %2306 = shalt.err (!%p2303_p5)
}
  0x8b   : > { %s2307_s3 = scalar_lea.vmem %s387_s16, 512  ;;  %p2315_p4 = scmp.lt.s32.totalorder %s387_s16, %s387_s16 }
  0x8c   : > { %p2308_p11 = scmp.ne.s32.totalorder %s387_s16, %s2307_s3  ;;  %p2316_p10 = scmp.lt.s32.totalorder %s2307_s3, %s2307_s3 }
  0x8e   : > { %p2310_p7 = pnand %p2308_p11, %p3224_p3  ;;  %p2317_p13 = por %p2316_p10, %p2315_p4 }
  0x90   : > { %p2311_p0 = pneg %p2310_p7 }
  0x92   : > { %p2318_p12 = pnand %p2317_p13, %p2311_p0 }
  0x94   : > { %2321 = shalt.err (!%p2318_p12)
}
  0x95   : > { %p3225_p1 = scmp.ne.s32.totalorder %s3209_s13, 0  ;;  %s3226_s30 = smov 8  }
  0x96   : > { %s3227_s9 = smov 128   ;;  %s2322_s11 = scalar_lea.hbm %s3165_s8, 16 }
  0x97   : > { %2094 = dma.hbm_to_vmem [thread:$0]  (!%p3225_p1), %s3162_s5, 512, %s387_s16, [#allocation12], %s3227_s9, %s3227_s9, %s3226_s30  }
  0x98   : > { %p2323_p6 = scmp.ne.s32.totalorder %s3165_s8, %s2322_s11  ;;  %p2329_p9 = scmp.lt.u32.totalorder %s2322_s11, %s3165_s8 }
  0x9a   : > { %p2325_p12 = pnand %p2323_p6, %p3224_p3 }
  0x9c   : > { %p2326_p8 = pneg %p2325_p12 }
  0x9e   : > { %p2331_p5 = pnand %p2329_p9, %p2326_p8 }
  0xa0   : > { %2334 = shalt.err (!%p2331_p5)
}
  0xa1   : > { %s2335_s21 = scalar_lea.vmem %s417_s1, 16  ;;  %s2342_s16 = scalar_lea.vmem %s417_s1, 32 }
  0xa2   : > { %p2336_p11 = scmp.ne.s32.totalorder %s417_s1, %s2335_s21  ;;  %p2343_p4 = scmp.lt.s32.totalorder %s417_s1, %s417_s1 }
  0xa3   : > { %p2344_p10 = scmp.lt.s32.totalorder %s2342_s16, %s2335_s21 }
  0xa4   : > { %p2338_p7 = pnand %p2336_p11, %p3224_p3 }
  0xa5   : > { %p2345_p13 = por %p2344_p10, %p2343_p4 }
  0xa6   : > { %p2339_p0 = pneg %p2338_p7 }
  0xa8   : > { %p2346_p2 = pnand %p2345_p13, %p2339_p0 }
  0xaa   : > { %2349 = shalt.err (!%p2346_p2)
}
  0xab   : > { %2100 = dma.hbm_to_vmem [thread:$0]  (!%p3225_p1), %s3165_s8, 16, %s417_s1, [#allocation15]  }
  0xac   : > { %s2867_s24 = scalar_lea.hbm %s3157_s0, %s2772_s10  ;;  %s437_s7 = scalar_lea.vmem [#allocation5], %s2776_s15 }
  0xad   : > { %s445_s13 = sshll.u32 %s437_s7, 4  ;;  %s2876_s12 = scalar_lea.hbm %s3159_s2, %s2772_s10  ;;  %s2870_s13 = int_to_ptr.vmem [resolvable:$true] %s445_s13 }
  0xae   : > { %s3228_s26 = sand.u32 1, %s2524_s23   ;;  %s2350_s3 = scalar_lea.hbm %s2867_s24, 128 }
  0xaf   : > { %s434_s1 = scalar_lea.sflag [#allocation6], %s3228_s26  ;;  %p2351_p2 = scmp.ne.s32.totalorder %s2867_s24, %s2350_s3 }
  0xb0   : > { %p3229_p3 = scmp.ne.s32.totalorder %s3223_s25, 0  ;;  %s2355_s30 = scalar_lea.hbm %s3157_s0, 256 }
  0xb1   : > { %p2356_p12 = scmp.lt.u32.totalorder %s2867_s24, %s3157_s0  ;;  %p2357_p8 = scmp.lt.u32.totalorder %s2355_s30, %s2350_s3 }
  0xb2   : > { %p2353_p1 = pnand %p2351_p2, %p3229_p3  ;;  %p2359_p5 = scmp.lt.u32.totalorder %s2350_s3, %s2867_s24 }
  0xb3   : > { %p2358_p9 = por %p2357_p8, %p2356_p12 }
  0xb4   : > { %p2354_p6 = pneg %p2353_p1 }
  0xb5   : > { %p2360_p11 = por %p2359_p5, %p2358_p9 }
  0xb7   : > { %p2361_p7 = pnand %p2360_p11, %p2354_p6 }
  0xb9   : > { %2364 = shalt.err (!%p2361_p7)
}
  0xba   : > { %s2365_s10 = scalar_lea.vmem %s2870_s13, 128  ;;  %s2545_s14 = smov [#allocation5]  }
  0xbb   : > { %p2366_p0 = scmp.ne.s32.totalorder %s2870_s13, %s2365_s10  ;;  %s2370_s7 = sshll.u32 %s2545_s14, 4  ;;  %s2371_s7 = int_to_ptr.vmem [resolvable:$false] %s2370_s7 }
  0xbc   : > { %s2372_s11 = scalar_lea.vmem %s2371_s7, 256  ;;  %p2373_p13 = scmp.lt.s32.totalorder %s2870_s13, %s2371_s7 }
  0xbd   : > { %p2368_p4 = pnand %p2366_p0, %p3229_p3  ;;  %p2374_p2 = scmp.lt.s32.totalorder %s2372_s11, %s2365_s10 }
  0xbf   : > { %p2369_p10 = pneg %p2368_p4  ;;  %p2375_p1 = por %p2374_p2, %p2373_p13 }
  0xc1   : > { %p2376_p12 = pnand %p2375_p1, %p2369_p10 }
  0xc3   : > { %2379 = shalt.err (!%p2376_p12)
}
  0xc4   : > { %p3230_p6 = scmp.ne.s32.totalorder %s3221_s17, 0  ;;  %s474_s18 = scalar_lea.vmem [#allocation10], %s2776_s15 }
  0xc5   : > { %s481_s26 = sshll.u32 %s474_s18, 4  ;;  %s2380_s3 = scalar_lea.hbm %s2876_s12, 128  ;;  %s482_s26 = int_to_ptr.vmem [resolvable:$true] %s481_s26 }
  0xc6   : > { %2104 = dma.hbm_to_vmem [thread:$0]  (!%p3230_p6), %s2867_s24, 128, %s2870_s13, %s434_s1  }
  0xc7   : > { %p2381_p8 = scmp.ne.s32.totalorder %s2876_s12, %s2380_s3  ;;  %s2385_s30 = scalar_lea.hbm %s3159_s2, 256 }
  0xc8   : > { %p2386_p11 = scmp.lt.u32.totalorder %s2876_s12, %s3159_s2  ;;  %p2387_p7 = scmp.lt.u32.totalorder %s2385_s30, %s2380_s3 }
  0xc9   : > { %p2383_p9 = pnand %p2381_p8, %p3229_p3  ;;  %p2389_p4 = scmp.lt.u32.totalorder %s2380_s3, %s2876_s12 }
  0xca   : > { %p2388_p0 = por %p2387_p7, %p2386_p11 }
  0xcb   : > { %p2384_p5 = pneg %p2383_p9 }
  0xcc   : > { %p2390_p10 = por %p2389_p4, %p2388_p0 }
  0xce   : > { %p2391_p13 = pnand %p2390_p10, %p2384_p5 }
  0xd0   : > { %2394 = shalt.err (!%p2391_p13)
}
  0xd1   : > { %s2395_s15 = scalar_lea.vmem %s482_s26, 128  ;;  %s2546_s24 = smov [#allocation10]  }
  0xd2   : > { %p2396_p2 = scmp.ne.s32.totalorder %s482_s26, %s2395_s15  ;;  %s2400_s13 = sshll.u32 %s2546_s24, 4  ;;  %s2401_s13 = int_to_ptr.vmem [resolvable:$false] %s2400_s13 }
  0xd3   : > { %s2402_s1 = scalar_lea.vmem %s2401_s13, 256  ;;  %p2403_p8 = scmp.lt.s32.totalorder %s482_s26, %s2401_s13 }
  0xd4   : > { %p2398_p1 = pnand %p2396_p2, %p3229_p3  ;;  %p2404_p9 = scmp.lt.s32.totalorder %s2402_s1, %s2395_s15 }
  0xd6   : > { %p2399_p12 = pneg %p2398_p1  ;;  %p2405_p6 = por %p2404_p9, %p2403_p8 }
  0xd8   : > { %p2406_p7 = pnand %p2405_p6, %p2399_p12 }
  0xda   : > { %2409 = shalt.err (!%p2406_p7)
}
  0xdb   : > { %p3231_p11 = scmp.ne.s32.totalorder %s3221_s17, 0  ;;  %p3232_p5 = scmp.ne.s32.totalorder %s3208_s28, 0 }
  0xdc   : > { %s2923_s25 = sand.u32 (!%p3232_p5), 1, %s2520_s22   ;;  %p3233_p3 = scmp.ne.s32.totalorder (!%p3232_p5), %s3215_s20, 0 }
  0xdd   : > { %2110 = dma.hbm_to_vmem [thread:$0]  (!%p3231_p11), %s2876_s12, 128, %s482_s26, %s2794_s19  }
  0xde   : > { %490 = sbr.rel (%p3232_p5) target bundleno = 2160 (0x870), region = 64  ;;  %s2926_s10 = sshll.u32 (!%p3232_p5), %s2923_s25, 3 }
  0xdf   : > { %s493_s14 = scalar_lea.sflag (!%p3232_p5), [#allocation6], %s2923_s25  ;;  %s496_s7 = scalar_lea.vmem (!%p3232_p5), [#allocation5], %s2926_s10 }
  0xe5   : > { %2491 = dma.done.wait (%p3233_p3), %s493_s14, 128  }
  0xe6   : > { %2493 = vsyncadd (%p3233_p3), %s493_s14, 4294967168  ;;  %s501_s28 = sand.u32 1, %s2655_s27   ;;  %s505_s19 = scalar_lea.vmem [#allocation8], %s2926_s10 }
  0xe7   : > { %s502_s17 = scalar_lea.sflag [#allocation9], %s501_s28 }
  0xe8   : > { %2495 = dma.done.wait (%p3233_p3), %s502_s17, 256  }
  0xe9   : > { %2497 = vsyncadd (%p3233_p3), %s502_s17, 4294967040  ;;  %s514_s12 = scalar_lea.vmem [#allocation10], %s2926_s10  ;;  %p3234_p6 = scmp.eq.s32.totalorder %s2655_s27, 0 }
  0xeb   : > { %2499 = dma.done.wait (%p3234_p6), [#allocation12], 1024   ;;  %p3235_p0 = pmov %p3234_p6 }
  0xed   : > { %2501 = vsyncadd (%p3235_p0), [#allocation12], 4294966272  ;;  %p3236_p4 = pmov %p3235_p0 }
  0xee   : > { %p3237_p10 = pmov %p3235_p0 }
  0xef   : > { %2503 = dma.done.wait (%p3236_p4), [#allocation15], 528  }
  0xf0   : > { %2505 = vsyncadd (%p3237_p10), [#allocation15], 4294966768  ;;  %v2547_v0 = vmov 0.0|0.0   ;;  %vm2548_vm0 = vmmov 0   ;;  %v2549_v1 = vmov 0.0   ;;  %v592_v2 = vld [vmem:[#allocation13] sm:$0xff] }
  0xf1   : > { %2038 = vmatprep.subr.bf16.mxu0 %v2547_v0  ;;  %1962 = vmatprep.mubr.msk.f32.mxu0 %vm2548_vm0, %v2549_v1  ;;  %v593_v3 = vld [vmem:[#allocation13 + $0x8] sm:$0xff]  ;;  %v594_v4 = vld [vmem:[#allocation13 + $0x10] sm:$0xff]  ;;  %v595_v6 = vld [vmem:[#allocation13 + $0x18] sm:$0xff]  ;;  %vm603_vm1 = vcmask 261120   ;;  %vm851_vm2 = vcmask 64512   ;;  %s2550_s26 = smov 120  }
  0xf2   : > { %2044 = vmatprep.subr.bf16.mxu1 %v2547_v0  ;;  %1973 = vmatprep.mubr.msk.f32.mxu1 %vm2548_vm0, %v2549_v1  ;;  %v2039_v5 = vpack.c.bf16 %v593_v3, %v592_v2  ;;  %v2042_v7 = vpack.c.bf16 %v595_v6, %v594_v4  ;;  %v678_v8 = vld [vmem:[#allocation14] sm:$0xff]  ;;  %v679_v9 = vld [vmem:[#allocation14 + $0x8] sm:$0xff]  ;;  %v766_v15 = vld [vmem:[#allocation11 + $0x10] sm:$0xff]  ;;  %s2551_s3 = smov 112   ;;  %s2552_s21 = smov 104   ;;  %vm1189_vm3 = vcmask 130112  }
  0xf3   : > { %v764_v10 = vld [vmem:[#allocation11] sm:$0xff]  ;;  %v765_v11 = vld [vmem:[#allocation11 + $0x8] sm:$0xff]  ;;  %v2045_v12 = vpack.c.bf16 %v679_v9, %v678_v8  ;;  %v767_v16 = vld [vmem:[#allocation11 + $0x18] sm:$0xff]  ;;  %s1886_s16 = sshll.u32 %s2923_s25, 5  ;;  %s3238_s15 = sld [smem:[#allocation37_spill]]  ;;  %vm1366_vm4 = vcmask 195712  }
  0xf4   : > { %2040 = vmatpush3.bf16.msra.mxu0 %v2039_v5  ;;  %v590_v13 = vld [vmem:[%s505_s19] sm:$0xff]  ;;  %v2051_v14 = vpack.c.bf16 %v765_v11, %v764_v10  ;;  %v2054_v17 = vpack.c.bf16 %v767_v16, %v766_v15  ;;  %v763_v18 = vld [vmem:[%s496_s7] sm:$0xff]  ;;  %s3010_s30 = scalar_lea.vmem [#allocation18], %s1886_s16  ;;  %s2553_s17 = smov 8   ;;  %vm1543_vm5 = vcmask 261312  }
  0xf5   : > { %2041 = vmatprep.subr.bf16.mxu0 %v2547_v0  ;;  %2046 = vmatpush3.bf16.msra.mxu1 %v2045_v12  ;;  %v680_v19 = vld [vmem:[#allocation14 + $0x10] sm:$0xff]  ;;  %v681_v20 = vld [vmem:[#allocation14 + $0x18] sm:$0xff]  ;;  %v1889_v32 = vld [vmem:[#allocation16] ss:$0 sm:$0xff]  ;;  %s2554_s19 = smov 16   ;;  %s2555_s27 = smov 24  }
  0xf6   : > { %2047 = vmatprep.subr.bf16.mxu1 %v2547_v0  ;;  %v2048_v21 = vpack.c.bf16 %v681_v20, %v680_v19  ;;  %v591_v22 = vld [vmem:[%s514_s12] sm:$0xff]  ;;  %s3239_s12 = sld [smem:[#allocation27_spill]]  ;;  %s3240_s20 = sld [smem:[#allocation31_spill]] }
  0xf7   : > { %v1887_v23 = vld [vmem:[%s3163_s6] ss:$0 sm:$0xff]  ;;  %s1665_s18 = sshll.u32 %s3010_s30, 4  ;;  %s1637_s29 = scalar_lea.sflag [#allocation19], %s2923_s25  ;;  %s3072_s18 = int_to_ptr.vmem [resolvable:$true] %s1665_s18 }
  0xf8   : > { %2043 = vmatpush3.bf16.msra.mxu0 %v2042_v7  ;;  %v1891_v27 = vld [vmem:[%s3161_s4] ss:$0 sm:$0xff]  ;;  %s2410_s24 = scalar_lea.vmem %s3072_s18, 512  ;;  %s2556_s13 = smov [#allocation18]  }
  0xf9   : > { %2050 = vmatprep.subr.bf16.mxu0 %v2547_v0  ;;  %2049 = vmatpush3.bf16.msra.mxu1 %v2048_v21  ;;  %p2411_p13 = scmp.ne.s32.totalorder %s3072_s18, %s2410_s24  ;;  %s2414_s1 = sshll.u32 %s2556_s13, 4  ;;  %s2415_s1 = int_to_ptr.vmem [resolvable:$false] %s2414_s1 }
  0xfa   : > { %1987 = vmatprep.subr.mxu1 %v2549_v1  ;;  %p2417_p8 = scmp.lt.s32.totalorder %s3072_s18, %s2415_s1 }
  0xfb   : > { %1963 = vmatmul.mubr.msk.f32.vlgmr.msra.gmra.mrb[0].mxu0 %vm603_vm1, %v590_v13 }
  0xfc   : > { %2052 = vmatpush3.bf16.msra.mxu0 %v2051_v14  ;;  %1984 = vmatprep.mubr.msk.f32.mxu0 %vm2548_vm0, %v2549_v1  ;;  %s1917_s11 = sshll.u32 %s3239_s12, 9  ;;  %p3243_p2 = scmp.ne.s32.totalorder %s3240_s20, 0 }
  0xfd   : > { %2053 = vmatprep.subr.bf16.mxu0 %v2547_v0  ;;  %1974 = vmatmul.mubr.msk.f32.vlgmr.msra.gmra.mrb[0].mxu1 %vm603_vm1, %v591_v22 }
  0xfe   : > { %1989 = vmatprep.mubr.msk.f32.mxu1 %vm2548_vm0, %v2549_v1  ;;  %p2412_p1 = pnand %p2411_p13, %p3243_p2 }
 0x100   : > { %2055 = vmatpush3.bf16.msra.mxu0 %v2054_v17  ;;  %p2413_p12 = pneg %p2412_p1 }
 0x101   : > { %2007 = vmatprep.subr.mxu0 %v2549_v1 }
 0x103   : > { %1985 = vmatmul.mubr.msk.f32.vlgmr.msra.gmra.mrb[2].mxu0 %vm603_vm1, %v763_v18 }
 0x104   : > { %2009 = vmatprep.mubr.msk.f32.mxu0 %vm2548_vm0, %v2549_v1 }
 0x1ce   : > { %v673_v24 = vpop.f32.mrb[0].mxu0 }
 0x1cf   : > { %v674_v25 = vadd.f32 %v1887_v23, %v673_v24  ;;  %v1964_v26 = vpop.f32.mrb[1].mxu0 }
 0x1d0   : > { %v758_v33 = vpop.f32.mrb[0].mxu1 }
 0x1d1   : > { %677 = vst.msk [vmem:[#allocation2] sm:$0xff] %vm603_vm1, %v674_v25  ;;  %v759_v34 = vadd.f32 %v1889_v32, %v758_v33  ;;  %v1975_v35 = vpop.f32.mrb[1].mxu1  ;;  %v1548_v33 = vld [vmem:[%s3238_s15 + $0x10] sm:$0xff] }
 0x1d3   : > { %762 = vst.msk [vmem:[#allocation3] sm:$0xff] %vm603_vm1, %v759_v34  ;;  %v1549_v34 = vld [vmem:[%s3238_s15 + $0x18] sm:$0xff] }
 0x1d6   : > { %v845_v28 = vpop.f32.mrb[2].mxu0 }
 0x1d7   : > { %v1986_v29 = vpop.f32.mrb[3].mxu0  ;;  %v846_v31 = vadd.f32 %v1891_v27, %v845_v28 }
 0x1d8   : > { %v1014_v30 = vld [vmem:[#allocation2] sm:$0xff] }
 0x1d9   : > { %1019 = vrot.lane.b32.xlu1 %v1014_v30, %s2550_s26  ;;  %1988 = vmatpush3.xpose.msk.msra.mxu1 %vm851_vm2, %v1014_v30 }
 0x1da   : > { %1992 = vmatprep.subr.mxu1 %v2549_v1  ;;  %v2992_v36 = vld [vmem:[#allocation3] sm:$0xff] }
 0x1dc   : > { %1990 = vmatmul.mubr.msk.f32.vlgmr.msra.gmra.mrb[2].mxu1 %vm851_vm2, %v846_v31 }
 0x1dd   : > { %1016 = vrot.lane.b32.xlu1 %v846_v31, %s2550_s26  ;;  %1994 = vmatprep.mubr.msk.f32.mxu1 %vm2548_vm0, %v2549_v1 }
 0x1de   : > { %1993 = vmatpush3.msra.mxu1 %v2992_v36 }
 0x1df   : > { %1997 = vmatprep.subr.mxu1 %v2549_v1 }
 0x1e1   : > { %1193 = vrot.lane.b32.xlu1 %v846_v31, %s2551_s3 }
 0x1e5   : > { %1373 = vrot.lane.b32.xlu1 %v1014_v30, %s2552_s21 }
 0x1e9   : > { %1370 = vrot.lane.b32.xlu1 %v846_v31, %s2552_s21  ;;  %v1547_v31 = vld [vmem:[%s3238_s15 + $0x8] sm:$0xff] }
 0x24b   : > { %v1020_v45 = vpop.permute.xlu1 %1019 }
 0x24f   : > { %v1017_v46 = vpop.permute.xlu1 %1016 }
 0x253   : > { %v1194_v47 = vpop.permute.xlu1 %1193 }
 0x257   : > { %v1374_v50 = vpop.permute.xlu1 %1373 }
 0x25b   : > { %v1371_v52 = vpop.permute.xlu1 %1370 }
 0x2af   : > { %v924_v37 = vpop.f32.mrb[2].mxu1 }
 0x2b0   : > { %v1991_v38 = vpop.f32.mrb[3].mxu1  ;;  %v928_v39 = vsel %vm851_vm2, %v924_v37, -inf }
 0x2b1   : > { %929 = vmax.xlane.f32.xlu0 %v928_v39 }
 0x33e   : > { %v930_v40 = vpop.xlane.xlu0 %929 }
 0x33f   : > { %v931_v41 = vsub.f32 %v924_v37, %v930_v40 }
 0x341   : > { %v932_v42 = vmul.f32 1.442695, %v931_v41 }
 0x343   : > { %2192 = vpow2.f32 %v932_v42 }
 0x34d   : > { %v2193_v43 = vpop.eup %2192 }
 0x34e   : > { %v934_v44 = vsel %vm851_vm2, %v2193_v43, 0.0 }
 0x34f   : > { %935 = vadd.xlane.f32.xlu0 %v934_v44 }
 0x365   : > { %1196 = vrot.lane.b32.xlu0 %v1014_v30, %s2551_s3  ;;  %v1546_v30 = vld [vmem:[%s3238_s15] sm:$0xff] }
 0x366   : > { %v2057_v32 = vpack.c.bf16 %v1547_v31, %v1546_v30 }
 0x3dc   : > { %v936_v48 = vpop.xlane.xlu0 %935 }
 0x3dd   : > { %2194 = vrcp.f32 %v936_v48 }
 0x3e0   : > { %v1197_v49 = vpop.permute.xlu0 %1196 }
 0x3e1   : > { %2008 = vmatpush3.xpose.msk.msra.mxu0 %vm851_vm2, %v1197_v49 }
 0x3e2   : > { %2017 = vmatprep.subr.mxu0 %v2549_v1 }
 0x3e4   : > { %2010 = vmatmul.mubr.msk.f32.vlgmr.msra.gmra.mrb[4].mxu0 %vm851_vm2, %v1194_v47 }
 0x3e5   : > { %2018 = vmatpush3.xpose.msk.msra.mxu0 %vm851_vm2, %v1374_v50  ;;  %2019 = vmatprep.mubr.msk.f32.mxu0 %vm2548_vm0, %v2549_v1 }
 0x3e6   : > { %2056 = vmatprep.subr.bf16.mxu0 %v2547_v0 }
 0x3e7   : > { %v2195_v51 = vpop.eup %2194 }
 0x3e8   : > { %v938_v53 = vmul.f32 %v2195_v51, %v2193_v43  ;;  %2020 = vmatmul.mubr.msk.f32.vlgmr.msra.gmra.mrb[6].mxu0 %vm851_vm2, %v1371_v52 }
 0x3e9   : > { %2035 = vmatprep.mubr.msk.f32.mxu0 %vm2548_vm0, %v2549_v1  ;;  %2058 = vmatpush3.bf16.msra.mxu0 %v2057_v32 }
 0x3ea   : > { %939 = vst.msk [vmem:[%s3010_s30] sm:$0xff] %vm851_vm2, %v938_v53  ;;  %1995 = vmatmul.mubr.msk.f32.vlgmr.msra.gmra.mrb[4].mxu1 %vm851_vm2, %v938_v53  ;;  %2059 = vmatprep.subr.bf16.mxu0 %v2547_v0 }
 0x3eb   : > { %1998 = vmatpush3.xpose.msk.msra.mxu1 %vm851_vm2, %v1020_v45  ;;  %1999 = vmatprep.mubr.msk.f32.mxu1 %vm2548_vm0, %v2549_v1 }
 0x3ec   : > { %2002 = vmatprep.subr.mxu1 %v2549_v1 }
 0x3ee   : > { %2000 = vmatmul.mubr.msk.f32.vlgmr.msra.gmra.mrb[6].mxu1 %vm851_vm2, %v1017_v46 }
 0x3ef   : > { %2004 = vmatprep.mubr.msk.f32.mxu1 %vm2548_vm0, %v2549_v1 }
 0x4b7   : > { %v1268_v54 = vpop.f32.mrb[4].mxu0 }
 0x4b8   : > { %v2011_v55 = vpop.f32.mrb[5].mxu0  ;;  %v1272_v56 = vsel %vm851_vm2, %v1268_v54, -inf }
 0x4b9   : > { %1273 = vmax.xlane.f32.xlu0 %v1272_v56 }
 0x4bb   : > { %v1445_v57 = vpop.f32.mrb[6].mxu0 }
 0x4bc   : > { %v2021_v58 = vpop.f32.mrb[7].mxu0  ;;  %v1449_v2 = vsel %vm851_vm2, %v1445_v57, -inf }
 0x4bd   : > { %v1009_v59 = vpop.f32.mrb[4].mxu1 }
 0x4be   : > { %1013 = vst.msk [vmem:[#allocation4] sm:$0xff] %vm851_vm2, %v1009_v59  ;;  %v1996_v60 = vpop.f32.mrb[5].mxu1 }
 0x4c1   : > { %v1091_v61 = vpop.f32.mrb[6].mxu1 }
 0x4c2   : > { %v2001_v62 = vpop.f32.mrb[7].mxu1  ;;  %v1095_v63 = vsel %vm851_vm2, %v1091_v61, -inf }
 0x4c3   : > { %1096 = vmax.xlane.f32.xlu1 %v1095_v63 }
 0x4c7   : > { %1450 = vmax.xlane.f32.xlu1 %v1449_v2 }
 0x546   : > { %v1274_v3 = vpop.xlane.xlu0 %1273 }
 0x547   : > { %v1275_v4 = vsub.f32 %v1268_v54, %v1274_v3 }
 0x549   : > { %v1276_v5 = vmul.f32 1.442695, %v1275_v4 }
 0x54b   : > { %2196 = vpow2.f32 %v1276_v5 }
 0x550   : > { %v1097_v6 = vpop.xlane.xlu1 %1096 }
 0x551   : > { %v1098_v14 = vsub.f32 %v1091_v61, %v1097_v6 }
 0x553   : > { %v1099_v15 = vmul.f32 1.442695, %v1098_v14 }
 0x554   : > { %v1451_v7 = vpop.xlane.xlu1 %1450 }
 0x555   : > { %v2197_v8 = vpop.eup %2196  ;;  %v1452_v9 = vsub.f32 %v1445_v57, %v1451_v7 }
 0x556   : > { %v1278_v10 = vsel %vm851_vm2, %v2197_v8, 0.0 }
 0x557   : > { %v1453_v11 = vmul.f32 1.442695, %v1452_v9  ;;  %1279 = vadd.xlane.f32.xlu0 %v1278_v10 }
 0x559   : > { %2198 = vpow2.f32 %v1453_v11 }
 0x55a   : > { %2200 = vpow2.f32 %v1099_v15 }
 0x563   : > { %v2199_v12 = vpop.eup %2198 }
 0x564   : > { %v1455_v13 = vsel %vm851_vm2, %v2199_v12, 0.0  ;;  %v2201_v16 = vpop.eup %2200 }
 0x565   : > { %1456 = vadd.xlane.f32.xlu1 %v1455_v13  ;;  %v1101_v17 = vsel %vm851_vm2, %v2201_v16, 0.0 }
 0x56d   : > { %1109 = vrot.lane.b32.xlu0 %v2992_v36, %s2550_s26 }
 0x576   : > { %1286 = vrot.lane.b32.xlu1 %v2992_v36, %s2551_s3 }
 0x59a   : > { %1102 = vadd.xlane.f32.xlu1 %v1101_v17 }
 0x5ab   : > { %1463 = vrot.lane.b32.xlu1 %v2992_v36, %s2552_s21  ;;  %s3241_s21 = sld [smem:[#allocation40_spill]] }
 0x5b1   : > { %s3242_s16 = smov %s3241_s21  ;;  %s3070_s9 = scalar_lea.hbm %s3241_s21, %s1917_s11 }
 0x5e4   : > { %v1280_v18 = vpop.xlane.xlu0 %1279 }
 0x5e5   : > { %2202 = vrcp.f32 %v1280_v18 }
 0x5e8   : > { %v1110_v19 = vpop.permute.xlu0 %1109 }
 0x5e9   : > { %2003 = vmatpush3.msra.mxu1 %v1110_v19 }
 0x5ea   : > { %2012 = vmatprep.subr.mxu1 %v2549_v1 }
 0x5ef   : > { %v2203_v20 = vpop.eup %2202 }
 0x5f0   : > { %v1282_v21 = vmul.f32 %v2203_v20, %v2197_v8 }
 0x5f2   : > { %1902 = vst.msk [vmem:[%s3010_s30 + $0x10] sm:$0xff] %vm851_vm2, %v1282_v21  ;;  %v1457_v22 = vpop.xlane.xlu1 %1456 }
 0x5f3   : > { %2204 = vrcp.f32 %v1457_v22 }
 0x5f6   : > { %v1287_v25 = vpop.permute.xlu1 %1286 }
 0x5fd   : > { %v2205_v23 = vpop.eup %2204 }
 0x5fe   : > { %v1459_v24 = vmul.f32 %v2205_v23, %v2199_v12 }
 0x600   : > { %1906 = vst.msk [vmem:[%s3010_s30 + $0x18] sm:$0xff] %vm851_vm2, %v1459_v24 }
 0x627   : > { %v1103_v26 = vpop.xlane.xlu1 %1102 }
 0x628   : > { %2206 = vrcp.f32 %v1103_v26 }
 0x62b   : > { %v1464_v29 = vpop.permute.xlu1 %1463 }
 0x632   : > { %v2207_v27 = vpop.eup %2206 }
 0x633   : > { %v1105_v28 = vmul.f32 %v2207_v27, %v2201_v16 }
 0x635   : > { %1898 = vst.msk [vmem:[%s3010_s30 + $0x8] sm:$0xff] %vm851_vm2, %v1105_v28  ;;  %2005 = vmatmul.mubr.msk.f32.vlgmr.msra.gmra.mrb[8].mxu1 %vm851_vm2, %v1105_v28  ;;  %s2416_s30 = scalar_lea.vmem %s2415_s1, 1024 }
 0x636   : > { %2013 = vmatpush3.msra.mxu1 %v1287_v25  ;;  %2014 = vmatprep.mubr.msk.f32.mxu1 %vm2548_vm0, %v2549_v1  ;;  %p2418_p9 = scmp.lt.s32.totalorder %s2416_s30, %s2410_s24 }
 0x637   : > { %2022 = vmatprep.subr.mxu1 %v2549_v1 }
 0x638   : > { %p2419_p7 = por %p2418_p9, %p2417_p8 }
 0x639   : > { %2015 = vmatmul.mubr.msk.f32.vlgmr.msra.gmra.mrb[10].mxu1 %vm851_vm2, %v1282_v21 }
 0x63a   : > { %2023 = vmatpush3.msra.mxu1 %v1464_v29  ;;  %2024 = vmatprep.mubr.msk.f32.mxu1 %vm2548_vm0, %v2549_v1  ;;  %v2060_v1 = vpack.c.bf16 %v1549_v34, %v1548_v33  ;;  %p2420_p11 = pnand %p2419_p7, %p2413_p12 }
 0x63c   : > { %2061 = vmatpush3.bf16.msra.mxu0 %v2060_v1 }
 0x63d   : > { %2025 = vmatmul.mubr.msk.f32.vlgmr.msra.gmra.mrb[12].mxu1 %vm851_vm2, %v1459_v24 }
 0x708   : > { %v1181_v35 = vpop.f32.mrb[8].mxu1 }
 0x709   : > { %1186 = vrot.lane.b32.xlu0 %v1181_v35, %s2553_s17  ;;  %v2006_v36 = vpop.f32.mrb[9].mxu1 }
 0x70c   : > { %v1358_v37 = vpop.f32.mrb[10].mxu1 }
 0x70d   : > { %1363 = vrot.lane.b32.xlu1 %v1358_v37, %s2554_s19  ;;  %v2016_v38 = vpop.f32.mrb[11].mxu1 }
 0x710   : > { %v1535_v39 = vpop.f32.mrb[12].mxu1 }
 0x711   : > { %1540 = vrot.lane.b32.xlu0 %v1535_v39, %s2555_s27  ;;  %v2026_v40 = vpop.f32.mrb[13].mxu1 }
 0x77b   : > { %v1187_v41 = vpop.permute.xlu0 %1186 }
 0x77c   : > { %1190 = vst.msk [vmem:[#allocation4] sm:$0xff] %vm1189_vm3, %v1187_v41 }
 0x77f   : > { %v1364_v0 = vpop.permute.xlu1 %1363 }
 0x780   : > { %1367 = vst.msk [vmem:[#allocation4] sm:$0xff] %vm1366_vm4, %v1364_v0 }
 0x783   : > { %v1541_v42 = vpop.permute.xlu0 %1540 }
 0x784   : > { %1544 = vst.msk [vmem:[#allocation4] sm:$0xff] %vm1543_vm5, %v1541_v42 }
 0x78b   : > { %v1545_v43 = vld [vmem:[#allocation4] sm:$0xff] }
 0x78c   : > { %2036 = vmatmul.mubr.msk.f32.vlgmr.msra.gmra.mrb[8].mxu0 %vm603_vm1, %v1545_v43 }
 0x78d   : > { %2423 = shalt.err (!%p2420_p11)
}
 0x78e   : > { %s2424_s14 = scalar_lea.hbm %s3070_s9, 512  ;;  %s2428_s19 = scalar_lea.hbm %s3242_s16, 1024 }
 0x78f   : > { %p2425_p5 = scmp.ne.s32.totalorder %s3070_s9, %s2424_s14  ;;  %p2429_p0 = scmp.lt.u32.totalorder %s3070_s9, %s3242_s16 }
 0x790   : > { %p2430_p4 = scmp.lt.u32.totalorder %s2428_s19, %s2424_s14  ;;  %p2432_p13 = scmp.lt.u32.totalorder %s2424_s14, %s3070_s9 }
 0x791   : > { %p2426_p3 = pnand %p2425_p5, %p3243_p2 }
 0x792   : > { %p2431_p10 = por %p2430_p4, %p2429_p0 }
 0x793   : > { %p2427_p6 = pneg %p2426_p3 }
 0x794   : > { %p2433_p1 = por %p2432_p13, %p2431_p10 }
 0x796   : > { %p2434_p12 = pnand %p2433_p1, %p2427_p6 }
 0x798   : > { %2437 = shalt.err (!%p2434_p12)
}
 0x799   : > { %s2557_s26 = smov 128   ;;  %s3244_s24 = sld [smem:[#allocation38_spill]] }
 0x79a   : > { %2085 = dma.vmem_to_hbm [thread:$0]  (%p3243_p2), %s3072_s18, 512, %s3070_s9, %s1637_s29, %s2557_s26, %s2557_s26, %s2553_s17  }
 0x79b   : > { %s1912_s13 = sshll.u32 %s3239_s12, 7  ;;  %s578_s1 = scalar_lea.vmem [#allocation17], %s2926_s10 }
 0x79c   : > { %s1651_s30 = sshll.u32 %s578_s1, 4  ;;  %s3245_s28 = sld [smem:[#allocation39_spill]]  ;;  %s3109_s30 = int_to_ptr.vmem [resolvable:$true] %s1651_s30 }
 0x79d   : > { %s1632_s17 = scalar_lea.sflag [#allocation7], %s2923_s25  ;;  %s2438_s18 = scalar_lea.vmem %s3109_s30, 128 }
 0x79e   : > { %p2439_p8 = scmp.ne.s32.totalorder %s3109_s30, %s2438_s18  ;;  %s2558_s10 = smov [#allocation17]  }
 0x79f   : > { %v1908_v44 = vld [vmem:[%s3244_s24] ss:$0 sm:$0xff]  ;;  %s2442_s12 = sshll.u32 %s2558_s10, 4  ;;  %s2443_s12 = int_to_ptr.vmem [resolvable:$false] %s2442_s12 }
 0x7a0   : > { %p2440_p9 = pnand %p2439_p8, %p3243_p2  ;;  %s2444_s9 = scalar_lea.vmem %s2443_s12, 256 }
 0x7a1   : > { %p2445_p11 = scmp.lt.s32.totalorder %s3109_s30, %s2443_s12  ;;  %p2446_p5 = scmp.lt.s32.totalorder %s2444_s9, %s2438_s18 }
 0x7a2   : > { %s3107_s19 = scalar_lea.hbm %s3245_s28, %s1912_s13  ;;  %p2441_p7 = pneg %p2440_p9 }
 0x7a3   : > { %p2447_p3 = por %p2446_p5, %p2445_p11 }
 0x7a5   : > { %p2448_p6 = pnand %p2447_p3, %p2441_p7 }
 0x85f   : > { %v1626_v45 = vpop.f32.mrb[8].mxu0 }
 0x860   : > { %v1627_v46 = vadd.f32 %v1908_v44, %v1626_v45  ;;  %v2037_v47 = vpop.f32.mrb[9].mxu0 }
 0x862   : > { %1630 = vst.msk [vmem:[%s578_s1] sm:$0xff] %vm603_vm1, %v1627_v46 }
 0x863   : > { %2451 = shalt.err (!%p2448_p6)
}
 0x864   : > { %s2452_s25 = scalar_lea.hbm %s3107_s19, 128  ;;  %s2456_s11 = scalar_lea.hbm %s3245_s28, 256 }
 0x865   : > { %p2453_p0 = scmp.ne.s32.totalorder %s3107_s19, %s2452_s25  ;;  %p2457_p13 = scmp.lt.u32.totalorder %s3107_s19, %s3245_s28 }
 0x866   : > { %p2458_p1 = scmp.lt.u32.totalorder %s2456_s11, %s2452_s25  ;;  %p2460_p8 = scmp.lt.u32.totalorder %s2452_s25, %s3107_s19 }
 0x867   : > { %p2454_p4 = pnand %p2453_p0, %p3243_p2 }
 0x868   : > { %p2459_p12 = por %p2458_p1, %p2457_p13 }
 0x869   : > { %p2455_p10 = pneg %p2454_p4 }
 0x86a   : > { %p2461_p9 = por %p2460_p8, %p2459_p12 }
 0x86c   : > { %p2462_p7 = pnand %p2461_p9, %p2455_p10 }
 0x86e   : > { %2465 = shalt.err (!%p2462_p7)
}
 0x86f   : > { %2084 = dma.vmem_to_hbm [thread:$0]  (%p3243_p2), %s3109_s30, 128, %s3107_s19, %s1632_s17  }
 0x870 PF: > { %s3246_s21 = sld [smem:[#allocation26_spill]]  ;;  %s3247_s24 = sld [smem:[#allocation33_spill]] }
 0x871   : > { %s3248_s13 = sld [smem:[#allocation29_spill]] }
 0x876   : > { %s1680_s1 = sand.u32 1, %s3246_s21   ;;  %p3249_p11 = scmp.ne.s32.totalorder %s3247_s24, 0 }
 0x877   : > { %p3250_p5 = scmp.ge.s32.totalorder %s3248_s13, 2  ;;  %s1681_s14 = scalar_lea.sflag [#allocation7], %s1680_s1 }
 0x879   : > { %p2112_p3 = pnand %p3250_p5, %p3249_p11 }
 0x87b   : > { %2507 = dma.done.wait (!%p2112_p3), %s1681_s14, 128  }
 0x87c   : > { %2509 = vsyncadd (!%p2112_p3), %s1681_s14, 4294967168  ;;  %s1690_s7 = scalar_lea.sflag [#allocation19], %s1680_s1 }
 0x87d   : > { %2511 = dma.done.wait (!%p2112_p3), %s1690_s7, 512  }
 0x87e   : > { %2513 = vsyncadd (!%p2112_p3), %s1690_s7, 4294966784  ;;  %s37_s26 = sadd.s32 1, %s3248_s13   ;;  %s3251_s20 = sld [smem:[#allocation32_spill]] }
 0x87f   : > { %p34_p6 = scmp.ge.s32.totalorder %s37_s26, 4   ;;  %s3252_s24 = sld [smem:[#allocation28_spill]] }
 0x880   : > { %s3253_s25 = sld [smem:[#allocation30_spill]]  ;;  %s3254_s21 = smov %s2520_s22 }
 0x881   : > { %s3255_s22 = smov %s2524_s23  ;;  %36 = sbr.rel (!%p34_p6) target bundleno = 20 (0x14), region = 173 }
 0x884   : > { %s3256_s23 = smov %s3251_s20 }
 0x888   :  { %1695 = vsyncpa [#allocation6], 1 }
 0x889   :  { %1697 = vsyncpa [#allocation6 + $0x1], 1 }
 0x88a   :  { %1698 = vsyncpa [#allocation9], 1 }
 0x88b   :  { %1700 = vsyncpa [#allocation9 + $0x1], 1 }
 0x88c   :  { %1701 = vsyncpa [#allocation12], 1 }
 0x88d   :  { %1702 = vsyncpa [#allocation15], 1 }
 0x88e   :  { %1703 = vsyncpa [#allocation7], 1 }
 0x88f   :  { %1705 = vsyncpa [#allocation7 + $0x1], 1 }
 0x890   :  { %1706 = vsyncpa [#allocation19], 1 }
 0x891   :  { %1708 = vsyncpa [#allocation19 + $0x1], 1 }

</bundles_post_ra>
